<compile_context>
chip_gen: v6e
topology: v6e:2x2x1
jax: 0.10.0
libtpu: 0.0.40
codegen_flags: <defaults>
</compile_context>

<pallas_src>
import functools

import jax
import jax.numpy as jnp
from jax import lax
from jax.experimental import pallas as pl
from jax.experimental.pallas import tpu as pltpu


def _decoder_kernel(x_ref, wih1_ref, whh1_ref, b1_ref,
                    wih2_ref, whh2_ref, b2_ref,
                    wout_ref, bout_ref,
                    out_ref,
                    *, seq_len, h1_dim, h2_dim):
    """Two stacked LSTM layers (batch = 1) + final linear, fully unrolled."""

    def cell(gates, c, hdim):
        # Gate columns stay in PyTorch order [i, f, g, o]; the g block's
        # pre-activation was pre-scaled by 2 in weight prep, so a single
        # full-width sigmoid covers all 4H lanes and
        # tanh(pre_g) == 2 * sigmoid(2 * pre_g) - 1 is recovered on the VPU.
        sg = jax.nn.sigmoid(gates)
        i = sg[:, 0 * hdim:1 * hdim]
        f = sg[:, 1 * hdim:2 * hdim]
        g = 2.0 * sg[:, 2 * hdim:3 * hdim] - 1.0
        o = sg[:, 3 * hdim:4 * hdim]
        c_new = f * c + i * g
        h_new = o * jnp.tanh(c_new)
        return h_new, c_new

    # Hoisted loop-invariant: every timestep's input is the same latent x.
    xg1 = (jnp.dot(x_ref[...], wih1_ref[...], preferred_element_type=jnp.float32)
           + b1_ref[...])

    h1 = jnp.zeros((1, h1_dim), jnp.float32)
    c1 = jnp.zeros((1, h1_dim), jnp.float32)
    h2 = jnp.zeros((1, h2_dim), jnp.float32)
    c2 = jnp.zeros((1, h2_dim), jnp.float32)

    h2_rows = []

    # Fully unrolled recurrence (seq_len is small & static).  Weight reads stay
    # inside the loop: they are off the critical path and this avoids pinning
    # ~29 vregs of loop-invariant weights across the whole unrolled body.
    for t in range(seq_len):
        gates1 = xg1 + jnp.dot(h1, whh1_ref[...],
                               preferred_element_type=jnp.float32)
        h1, c1 = cell(gates1, c1, h1_dim)

        gates2 = (jnp.dot(h1, wih2_ref[...], preferred_element_type=jnp.float32)
                  + jnp.dot(h2, whh2_ref[...], preferred_element_type=jnp.float32)
                  + b2_ref[...])
        h2, c2 = cell(gates2, c2, h2_dim)

        h2_rows.append(h2)

    # output_layer: (seq_len, hidden_dim) @ (hidden_dim, n_features) + bias.
    # h2 rows never touch VMEM scratch; they are assembled from vregs here.
    h2_all = jnp.concatenate(h2_rows, axis=0)
    out_ref[...] = (jnp.dot(h2_all, wout_ref[...],
                            preferred_element_type=jnp.float32)
                    + bout_ref[...]).astype(out_ref.dtype)


def _scale_g_gate(w_t, hdim):
    """Pre-scale the g-gate block (PyTorch order [i,f,g,o]) of the last axis by 2.

    Enables tanh(pre_g) = 2 * sigmoid(2 * pre_g) - 1 inside the kernel, so each
    cell issues one wide sigmoid instead of a sigmoid + tanh pair.
    """
    return w_t.at[..., 2 * hdim:3 * hdim].multiply(2.0)


def prepare_decoder_params(params, *, input_dim, n_features):
    """One-time kernel-ready weight prep (transpose + g-gate scale + bias fuse).

    Call once and reuse across forward calls so the hot path does no XLA
    transposes / adds.
    """
    hidden_dim = 2 * input_dim
    prepared = {
        "wih1": _scale_g_gate(params["W_ih1"].T, input_dim),       # (in, 4*in)
        "whh1": _scale_g_gate(params["W_hh1"].T, input_dim),       # (in, 4*in)
        "b1": _scale_g_gate((params["b_ih1"] + params["b_hh1"]).reshape(1, -1),
                            input_dim),                             # (1, 4*in)
        "wih2": _scale_g_gate(params["W_ih2"].T, hidden_dim),      # (in, 4*hid)
        "whh2": _scale_g_gate(params["W_hh2"].T, hidden_dim),      # (hid, 4*hid)
        "b2": _scale_g_gate((params["b_ih2"] + params["b_hh2"]).reshape(1, -1),
                            hidden_dim),                            # (1, 4*hid)
        "wout": params["W_out"].T,                                  # (hid, n_features)
        "bout": params["b_out"].reshape(1, -1),                     # (1, n_features)
    }
    return jax.tree.map(lambda a: jnp.asarray(a, jnp.float32), prepared)


def _cost_estimate(seq_len, input_dim, n_features):
    hidden_dim = 2 * input_dim
    # Per step: layer-1 recurrent matmul + layer-2 input & recurrent matmuls.
    step_flops = (2 * input_dim * 4 * input_dim
                  + 2 * input_dim * 4 * hidden_dim
                  + 2 * hidden_dim * 4 * hidden_dim)
    flops = (seq_len * step_flops
             + 2 * input_dim * 4 * input_dim            # hoisted x @ W_ih1
             + 2 * seq_len * hidden_dim * n_features)   # final projection
    # Per cell: 4H-wide sigmoid + H-wide tanh(c).
    transcendentals = seq_len * (5 * input_dim + 5 * hidden_dim)
    weight_elems = (2 * input_dim * 4 * input_dim + 4 * input_dim
                    + input_dim * 4 * hidden_dim + hidden_dim * 4 * hidden_dim
                    + 4 * hidden_dim + hidden_dim * n_features + n_features)
    bytes_accessed = 4 * (weight_elems + input_dim + seq_len * n_features)
    return pl.CostEstimate(flops=flops, transcendentals=transcendentals,
                           bytes_accessed=bytes_accessed)


def decoder_forward(x, prepared, *, seq_len, input_dim, n_features):
    # TODO(synk): the PyTorch repeat/reshape batch semantics only reduce to a
    # single time-major sequence for n_features == 1; larger n_features would
    # need an explicit batch dimension (and a "parallel" grid axis so v7x's
    # second TensorCore could be used).
    assert n_features == 1, "kernel assumes n_features == 1"
    hidden_dim = 2 * input_dim
    x = jnp.asarray(x, jnp.float32).reshape(1, input_dim)

    kernel = functools.partial(_decoder_kernel, seq_len=seq_len,
                               h1_dim=input_dim, h2_dim=hidden_dim)
    return pl.pallas_call(
        kernel,
        out_shape=jax.ShapeDtypeStruct((seq_len, n_features), jnp.float32),
        in_specs=[pl.BlockSpec(memory_space=pltpu.MemorySpace.VMEM)] * 9,
        out_specs=pl.BlockSpec(memory_space=pltpu.MemorySpace.VMEM),
        cost_estimate=_cost_estimate(seq_len, input_dim, n_features),
    )(x, prepared["wih1"], prepared["whh1"], prepared["b1"],
      prepared["wih2"], prepared["whh2"], prepared["b2"],
      prepared["wout"], prepared["bout"])


# ---------------- pure-JAX reference (for correctness check only) ----------------

def _lstm_ref(x_seq, W_ih, W_hh, b_ih, b_hh):
    H = W_hh.shape[1]

    def step(carry, x_t):
        h, c = carry
        gates = x_t @ W_ih.T + b_ih + h @ W_hh.T + b_hh
        i, f, g, o = jnp.split(gates, 4)
        i = jax.nn.sigmoid(i)
        f = jax.nn.sigmoid(f)
        g = jnp.tanh(g)
        o = jax.nn.sigmoid(o)
        c = f * c + i * g
        h = o * jnp.tanh(c)
        return (h, c), h

    (_, _), hs = lax.scan(step, (jnp.zeros(H), jnp.zeros(H)), x_seq)
    return hs


def _decoder_ref(x, params, *, seq_len, input_dim, n_features):
    x_rep = jnp.tile(x, (seq_len, n_features)).reshape(n_features, seq_len, input_dim)
    x_seq = x_rep.reshape(seq_len, input_dim)
    h1 = _lstm_ref(x_seq, params["W_ih1"], params["W_hh1"], params["b_ih1"], params["b_hh1"])
    h2 = _lstm_ref(h1, params["W_ih2"], params["W_hh2"], params["b_ih2"], params["b_hh2"])
    return h2 @ params["W_out"].T + params["b_out"]


# ---------------- deterministic parameter init (PyTorch-like shapes) --------------

def init_params(key, input_dim, n_features):
    hidden_dim = 2 * input_dim
    ks = jax.random.split(key, 10)

    def u(k, shape, fan):
        bound = 1.0 / jnp.sqrt(jnp.asarray(fan, jnp.float32))
        return jax.random.uniform(k, shape, jnp.float32, -bound, bound)

    return {
        "W_ih1": u(ks[0], (4 * input_dim, input_dim), input_dim),
        "W_hh1": u(ks[1], (4 * input_dim, input_dim), input_dim),
        "b_ih1": u(ks[2], (4 * input_dim,), input_dim),
        "b_hh1": u(ks[3], (4 * input_dim,), input_dim),
        "W_ih2": u(ks[4], (4 * hidden_dim, input_dim), hidden_dim),
        "W_hh2": u(ks[5], (4 * hidden_dim, hidden_dim), hidden_dim),
        "b_ih2": u(ks[6], (4 * hidden_dim,), hidden_dim),
        "b_hh2": u(ks[7], (4 * hidden_dim,), hidden_dim),
        "W_out": u(ks[8], (n_features, hidden_dim), hidden_dim),
        "b_out": u(ks[9], (n_features,), hidden_dim),
    }


if __name__ == "__main__":
    seq_len, input_dim, n_features = 8, 32, 1   # hidden_dim = 64
    key = jax.random.PRNGKey(0)
    k_x, k_p = jax.random.split(key)
    # latent vector from the encoder: shape (n_features, input_dim) = (1, 32)
    x = jax.random.normal(k_x, (n_features, input_dim), jnp.float32)
    params = init_params(k_p, input_dim, n_features)

    # One-time weight prep (transpose / g-gate scale / bias fuse) -- cacheable.
    prepared = prepare_decoder_params(params, input_dim=input_dim,
                                      n_features=n_features)

    out = decoder_forward(x, prepared, seq_len=seq_len,
                          input_dim=input_dim, n_features=n_features)
    out = jax.block_until_ready(out)

    ref = _decoder_ref(x, params, seq_len=seq_len,
                       input_dim=input_dim, n_features=n_features)
    assert out.shape == (seq_len, n_features), out.shape
    assert jnp.allclose(out, ref, atol=1e-4, rtol=1e-4), (out, ref)
    print("KERNEL_OK")
</pallas_src>

<mosaic_0001>
module attributes {stable_mosaic.version = 11 : i64} {
  func.func @_decoder_kernel(%arg0: memref<1x32xf32, #tpu.memory_space<vmem>>, %arg1: memref<32x128xf32, #tpu.memory_space<vmem>>, %arg2: memref<32x128xf32, #tpu.memory_space<vmem>>, %arg3: memref<1x128xf32, #tpu.memory_space<vmem>>, %arg4: memref<32x256xf32, #tpu.memory_space<vmem>>, %arg5: memref<64x256xf32, #tpu.memory_space<vmem>>, %arg6: memref<1x256xf32, #tpu.memory_space<vmem>>, %arg7: memref<64x1xf32, #tpu.memory_space<vmem>>, %arg8: memref<1x1xf32, #tpu.memory_space<vmem>>, %arg9: memref<8x1xf32, #tpu.memory_space<vmem>>) attributes {dimension_semantics = [], scalar_prefetch = 0 : i64, scratch_operands = 0 : i64, tpu.core_type = #tpu.core_type<tc>} {
    %c0 = arith.constant 0 : index
    %c0_0 = arith.constant 0 : index
    %0 = vector.load %arg0[%c0, %c0_0] : memref<1x32xf32, #tpu.memory_space<vmem>>, vector<1x32xf32>
    %c0_1 = arith.constant 0 : index
    %c0_2 = arith.constant 0 : index
    %1 = vector.load %arg1[%c0_1, %c0_2] : memref<32x128xf32, #tpu.memory_space<vmem>>, vector<32x128xf32>
    %cst = arith.constant dense<0.000000e+00> : vector<1x128xf32>
    %2 = tpu.matmul %0, %1, %cst {dimension_numbers = #tpu.dot_dimension_numbers<[1], [0], [0], [1], [0, 0, 1, 1], [], []>} : vector<1x32xf32>, vector<32x128xf32>, vector<1x128xf32> -> vector<1x128xf32>
    %c0_3 = arith.constant 0 : index
    %c0_4 = arith.constant 0 : index
    %3 = vector.load %arg3[%c0_3, %c0_4] : memref<1x128xf32, #tpu.memory_space<vmem>>, vector<1x128xf32>
    %4 = arith.addf %2, %3 : vector<1x128xf32>
    %cst_5 = arith.constant 0.000000e+00 : f32
    %5 = vector.broadcast %cst_5 : f32 to vector<1x32xf32>
    %cst_6 = arith.constant 0.000000e+00 : f32
    %6 = vector.broadcast %cst_6 : f32 to vector<1x32xf32>
    %cst_7 = arith.constant 0.000000e+00 : f32
    %7 = vector.broadcast %cst_7 : f32 to vector<1x64xf32>
    %cst_8 = arith.constant 0.000000e+00 : f32
    %8 = vector.broadcast %cst_8 : f32 to vector<1x64xf32>
    %c0_9 = arith.constant 0 : index
    %c0_10 = arith.constant 0 : index
    %9 = vector.load %arg2[%c0_9, %c0_10] : memref<32x128xf32, #tpu.memory_space<vmem>>, vector<32x128xf32>
    %cst_11 = arith.constant dense<0.000000e+00> : vector<1x128xf32>
    %10 = tpu.matmul %5, %9, %cst_11 {dimension_numbers = #tpu.dot_dimension_numbers<[1], [0], [0], [1], [0, 0, 1, 1], [], []>} : vector<1x32xf32>, vector<32x128xf32>, vector<1x128xf32> -> vector<1x128xf32>
    %11 = arith.addf %4, %10 : vector<1x128xf32>
    %12 = arith.negf %11 : vector<1x128xf32>
    %13 = math.exp %12 : vector<1x128xf32>
    %cst_12 = arith.constant 1.000000e+00 : f32
    %14 = vector.broadcast %cst_12 : f32 to vector<1x128xf32>
    %15 = arith.addf %14, %13 : vector<1x128xf32>
    %16 = arith.divf %14, %15 : vector<1x128xf32>
    %17 = vector.extract_strided_slice %16 {offsets = [0, 0], sizes = [1, 32], strides = [1, 1]} : vector<1x128xf32> to vector<1x32xf32>
    %18 = vector.extract_strided_slice %16 {offsets = [0, 32], sizes = [1, 32], strides = [1, 1]} : vector<1x128xf32> to vector<1x32xf32>
    %19 = vector.extract_strided_slice %16 {offsets = [0, 64], sizes = [1, 32], strides = [1, 1]} : vector<1x128xf32> to vector<1x32xf32>
    %cst_13 = arith.constant 2.000000e+00 : f32
    %20 = vector.broadcast %cst_13 : f32 to vector<1x32xf32>
    %21 = arith.mulf %20, %19 : vector<1x32xf32>
    %cst_14 = arith.constant 1.000000e+00 : f32
    %22 = vector.broadcast %cst_14 : f32 to vector<1x32xf32>
    %23 = arith.subf %21, %22 : vector<1x32xf32>
    %24 = vector.extract_strided_slice %16 {offsets = [0, 96], sizes = [1, 32], strides = [1, 1]} : vector<1x128xf32> to vector<1x32xf32>
    %25 = arith.mulf %18, %6 : vector<1x32xf32>
    %26 = arith.mulf %17, %23 : vector<1x32xf32>
    %27 = arith.addf %25, %26 : vector<1x32xf32>
    %28 = math.tanh %27 : vector<1x32xf32>
    %29 = arith.mulf %24, %28 : vector<1x32xf32>
    %c0_15 = arith.constant 0 : index
    %c0_16 = arith.constant 0 : index
    %30 = vector.load %arg4[%c0_15, %c0_16] : memref<32x256xf32, #tpu.memory_space<vmem>>, vector<32x256xf32>
    %cst_17 = arith.constant dense<0.000000e+00> : vector<1x256xf32>
    %31 = tpu.matmul %29, %30, %cst_17 {dimension_numbers = #tpu.dot_dimension_numbers<[1], [0], [0], [1], [0, 0, 1, 1], [], []>} : vector<1x32xf32>, vector<32x256xf32>, vector<1x256xf32> -> vector<1x256xf32>
    %c0_18 = arith.constant 0 : index
    %c0_19 = arith.constant 0 : index
    %32 = vector.load %arg5[%c0_18, %c0_19] : memref<64x256xf32, #tpu.memory_space<vmem>>, vector<64x256xf32>
    %cst_20 = arith.constant dense<0.000000e+00> : vector<1x256xf32>
    %33 = tpu.matmul %7, %32, %cst_20 {dimension_numbers = #tpu.dot_dimension_numbers<[1], [0], [0], [1], [0, 0, 1, 1], [], []>} : vector<1x64xf32>, vector<64x256xf32>, vector<1x256xf32> -> vector<1x256xf32>
    %34 = arith.addf %31, %33 : vector<1x256xf32>
    %c0_21 = arith.constant 0 : index
    %c0_22 = arith.constant 0 : index
    %35 = vector.load %arg6[%c0_21, %c0_22] : memref<1x256xf32, #tpu.memory_space<vmem>>, vector<1x256xf32>
    %36 = arith.addf %34, %35 : vector<1x256xf32>
    %37 = arith.negf %36 : vector<1x256xf32>
    %38 = math.exp %37 : vector<1x256xf32>
    %cst_23 = arith.constant 1.000000e+00 : f32
    %39 = vector.broadcast %cst_23 : f32 to vector<1x256xf32>
    %40 = arith.addf %39, %38 : vector<1x256xf32>
    %41 = arith.divf %39, %40 : vector<1x256xf32>
    %42 = vector.extract_strided_slice %41 {offsets = [0, 0], sizes = [1, 64], strides = [1, 1]} : vector<1x256xf32> to vector<1x64xf32>
    %43 = vector.extract_strided_slice %41 {offsets = [0, 64], sizes = [1, 64], strides = [1, 1]} : vector<1x256xf32> to vector<1x64xf32>
    %44 = vector.extract_strided_slice %41 {offsets = [0, 128], sizes = [1, 64], strides = [1, 1]} : vector<1x256xf32> to vector<1x64xf32>
    %cst_24 = arith.constant 2.000000e+00 : f32
    %45 = vector.broadcast %cst_24 : f32 to vector<1x64xf32>
    %46 = arith.mulf %45, %44 : vector<1x64xf32>
    %cst_25 = arith.constant 1.000000e+00 : f32
    %47 = vector.broadcast %cst_25 : f32 to vector<1x64xf32>
    %48 = arith.subf %46, %47 : vector<1x64xf32>
    %49 = vector.extract_strided_slice %41 {offsets = [0, 192], sizes = [1, 64], strides = [1, 1]} : vector<1x256xf32> to vector<1x64xf32>
    %50 = arith.mulf %43, %8 : vector<1x64xf32>
    %51 = arith.mulf %42, %48 : vector<1x64xf32>
    %52 = arith.addf %50, %51 : vector<1x64xf32>
    %53 = math.tanh %52 : vector<1x64xf32>
    %54 = arith.mulf %49, %53 : vector<1x64xf32>
    %c0_26 = arith.constant 0 : index
    %c0_27 = arith.constant 0 : index
    %55 = vector.load %arg2[%c0_26, %c0_27] : memref<32x128xf32, #tpu.memory_space<vmem>>, vector<32x128xf32>
    %cst_28 = arith.constant dense<0.000000e+00> : vector<1x128xf32>
    %56 = tpu.matmul %29, %55, %cst_28 {dimension_numbers = #tpu.dot_dimension_numbers<[1], [0], [0], [1], [0, 0, 1, 1], [], []>} : vector<1x32xf32>, vector<32x128xf32>, vector<1x128xf32> -> vector<1x128xf32>
    %57 = arith.addf %4, %56 : vector<1x128xf32>
    %58 = arith.negf %57 : vector<1x128xf32>
    %59 = math.exp %58 : vector<1x128xf32>
    %cst_29 = arith.constant 1.000000e+00 : f32
    %60 = vector.broadcast %cst_29 : f32 to vector<1x128xf32>
    %61 = arith.addf %60, %59 : vector<1x128xf32>
    %62 = arith.divf %60, %61 : vector<1x128xf32>
    %63 = vector.extract_strided_slice %62 {offsets = [0, 0], sizes = [1, 32], strides = [1, 1]} : vector<1x128xf32> to vector<1x32xf32>
    %64 = vector.extract_strided_slice %62 {offsets = [0, 32], sizes = [1, 32], strides = [1, 1]} : vector<1x128xf32> to vector<1x32xf32>
    %65 = vector.extract_strided_slice %62 {offsets = [0, 64], sizes = [1, 32], strides = [1, 1]} : vector<1x128xf32> to vector<1x32xf32>
    %cst_30 = arith.constant 2.000000e+00 : f32
    %66 = vector.broadcast %cst_30 : f32 to vector<1x32xf32>
    %67 = arith.mulf %66, %65 : vector<1x32xf32>
    %cst_31 = arith.constant 1.000000e+00 : f32
    %68 = vector.broadcast %cst_31 : f32 to vector<1x32xf32>
    %69 = arith.subf %67, %68 : vector<1x32xf32>
    %70 = vector.extract_strided_slice %62 {offsets = [0, 96], sizes = [1, 32], strides = [1, 1]} : vector<1x128xf32> to vector<1x32xf32>
    %71 = arith.mulf %64, %27 : vector<1x32xf32>
    %72 = arith.mulf %63, %69 : vector<1x32xf32>
    %73 = arith.addf %71, %72 : vector<1x32xf32>
    %74 = math.tanh %73 : vector<1x32xf32>
    %75 = arith.mulf %70, %74 : vector<1x32xf32>
    %c0_32 = arith.constant 0 : index
    %c0_33 = arith.constant 0 : index
    %76 = vector.load %arg4[%c0_32, %c0_33] : memref<32x256xf32, #tpu.memory_space<vmem>>, vector<32x256xf32>
    %cst_34 = arith.constant dense<0.000000e+00> : vector<1x256xf32>
    %77 = tpu.matmul %75, %76, %cst_34 {dimension_numbers = #tpu.dot_dimension_numbers<[1], [0], [0], [1], [0, 0, 1, 1], [], []>} : vector<1x32xf32>, vector<32x256xf32>, vector<1x256xf32> -> vector<1x256xf32>
    %c0_35 = arith.constant 0 : index
    %c0_36 = arith.constant 0 : index
    %78 = vector.load %arg5[%c0_35, %c0_36] : memref<64x256xf32, #tpu.memory_space<vmem>>, vector<64x256xf32>
    %cst_37 = arith.constant dense<0.000000e+00> : vector<1x256xf32>
    %79 = tpu.matmul %54, %78, %cst_37 {dimension_numbers = #tpu.dot_dimension_numbers<[1], [0], [0], [1], [0, 0, 1, 1], [], []>} : vector<1x64xf32>, vector<64x256xf32>, vector<1x256xf32> -> vector<1x256xf32>
    %80 = arith.addf %77, %79 : vector<1x256xf32>
    %c0_38 = arith.constant 0 : index
    %c0_39 = arith.constant 0 : index
    %81 = vector.load %arg6[%c0_38, %c0_39] : memref<1x256xf32, #tpu.memory_space<vmem>>, vector<1x256xf32>
    %82 = arith.addf %80, %81 : vector<1x256xf32>
    %83 = arith.negf %82 : vector<1x256xf32>
    %84 = math.exp %83 : vector<1x256xf32>
    %cst_40 = arith.constant 1.000000e+00 : f32
    %85 = vector.broadcast %cst_40 : f32 to vector<1x256xf32>
    %86 = arith.addf %85, %84 : vector<1x256xf32>
    %87 = arith.divf %85, %86 : vector<1x256xf32>
    %88 = vector.extract_strided_slice %87 {offsets = [0, 0], sizes = [1, 64], strides = [1, 1]} : vector<1x256xf32> to vector<1x64xf32>
    %89 = vector.extract_strided_slice %87 {offsets = [0, 64], sizes = [1, 64], strides = [1, 1]} : vector<1x256xf32> to vector<1x64xf32>
    %90 = vector.extract_strided_slice %87 {offsets = [0, 128], sizes = [1, 64], strides = [1, 1]} : vector<1x256xf32> to vector<1x64xf32>
    %cst_41 = arith.constant 2.000000e+00 : f32
    %91 = vector.broadcast %cst_41 : f32 to vector<1x64xf32>
    %92 = arith.mulf %91, %90 : vector<1x64xf32>
    %cst_42 = arith.constant 1.000000e+00 : f32
    %93 = vector.broadcast %cst_42 : f32 to vector<1x64xf32>
    %94 = arith.subf %92, %93 : vector<1x64xf32>
    %95 = vector.extract_strided_slice %87 {offsets = [0, 192], sizes = [1, 64], strides = [1, 1]} : vector<1x256xf32> to vector<1x64xf32>
    %96 = arith.mulf %89, %52 : vector<1x64xf32>
    %97 = arith.mulf %88, %94 : vector<1x64xf32>
    %98 = arith.addf %96, %97 : vector<1x64xf32>
    %99 = math.tanh %98 : vector<1x64xf32>
    %100 = arith.mulf %95, %99 : vector<1x64xf32>
    %c0_43 = arith.constant 0 : index
    %c0_44 = arith.constant 0 : index
    %101 = vector.load %arg2[%c0_43, %c0_44] : memref<32x128xf32, #tpu.memory_space<vmem>>, vector<32x128xf32>
    %cst_45 = arith.constant dense<0.000000e+00> : vector<1x128xf32>
    %102 = tpu.matmul %75, %101, %cst_45 {dimension_numbers = #tpu.dot_dimension_numbers<[1], [0], [0], [1], [0, 0, 1, 1], [], []>} : vector<1x32xf32>, vector<32x128xf32>, vector<1x128xf32> -> vector<1x128xf32>
    %103 = arith.addf %4, %102 : vector<1x128xf32>
    %104 = arith.negf %103 : vector<1x128xf32>
    %105 = math.exp %104 : vector<1x128xf32>
    %cst_46 = arith.constant 1.000000e+00 : f32
    %106 = vector.broadcast %cst_46 : f32 to vector<1x128xf32>
    %107 = arith.addf %106, %105 : vector<1x128xf32>
    %108 = arith.divf %106, %107 : vector<1x128xf32>
    %109 = vector.extract_strided_slice %108 {offsets = [0, 0], sizes = [1, 32], strides = [1, 1]} : vector<1x128xf32> to vector<1x32xf32>
    %110 = vector.extract_strided_slice %108 {offsets = [0, 32], sizes = [1, 32], strides = [1, 1]} : vector<1x128xf32> to vector<1x32xf32>
    %111 = vector.extract_strided_slice %108 {offsets = [0, 64], sizes = [1, 32], strides = [1, 1]} : vector<1x128xf32> to vector<1x32xf32>
    %cst_47 = arith.constant 2.000000e+00 : f32
    %112 = vector.broadcast %cst_47 : f32 to vector<1x32xf32>
    %113 = arith.mulf %112, %111 : vector<1x32xf32>
    %cst_48 = arith.constant 1.000000e+00 : f32
    %114 = vector.broadcast %cst_48 : f32 to vector<1x32xf32>
    %115 = arith.subf %113, %114 : vector<1x32xf32>
    %116 = vector.extract_strided_slice %108 {offsets = [0, 96], sizes = [1, 32], strides = [1, 1]} : vector<1x128xf32> to vector<1x32xf32>
    %117 = arith.mulf %110, %73 : vector<1x32xf32>
    %118 = arith.mulf %109, %115 : vector<1x32xf32>
    %119 = arith.addf %117, %118 : vector<1x32xf32>
    %120 = math.tanh %119 : vector<1x32xf32>
    %121 = arith.mulf %116, %120 : vector<1x32xf32>
    %c0_49 = arith.constant 0 : index
    %c0_50 = arith.constant 0 : index
    %122 = vector.load %arg4[%c0_49, %c0_50] : memref<32x256xf32, #tpu.memory_space<vmem>>, vector<32x256xf32>
    %cst_51 = arith.constant dense<0.000000e+00> : vector<1x256xf32>
    %123 = tpu.matmul %121, %122, %cst_51 {dimension_numbers = #tpu.dot_dimension_numbers<[1], [0], [0], [1], [0, 0, 1, 1], [], []>} : vector<1x32xf32>, vector<32x256xf32>, vector<1x256xf32> -> vector<1x256xf32>
    %c0_52 = arith.constant 0 : index
    %c0_53 = arith.constant 0 : index
    %124 = vector.load %arg5[%c0_52, %c0_53] : memref<64x256xf32, #tpu.memory_space<vmem>>, vector<64x256xf32>
    %cst_54 = arith.constant dense<0.000000e+00> : vector<1x256xf32>
    %125 = tpu.matmul %100, %124, %cst_54 {dimension_numbers = #tpu.dot_dimension_numbers<[1], [0], [0], [1], [0, 0, 1, 1], [], []>} : vector<1x64xf32>, vector<64x256xf32>, vector<1x256xf32> -> vector<1x256xf32>
    %126 = arith.addf %123, %125 : vector<1x256xf32>
    %c0_55 = arith.constant 0 : index
    %c0_56 = arith.constant 0 : index
    %127 = vector.load %arg6[%c0_55, %c0_56] : memref<1x256xf32, #tpu.memory_space<vmem>>, vector<1x256xf32>
    %128 = arith.addf %126, %127 : vector<1x256xf32>
    %129 = arith.negf %128 : vector<1x256xf32>
    %130 = math.exp %129 : vector<1x256xf32>
    %cst_57 = arith.constant 1.000000e+00 : f32
    %131 = vector.broadcast %cst_57 : f32 to vector<1x256xf32>
    %132 = arith.addf %131, %130 : vector<1x256xf32>
    %133 = arith.divf %131, %132 : vector<1x256xf32>
    %134 = vector.extract_strided_slice %133 {offsets = [0, 0], sizes = [1, 64], strides = [1, 1]} : vector<1x256xf32> to vector<1x64xf32>
    %135 = vector.extract_strided_slice %133 {offsets = [0, 64], sizes = [1, 64], strides = [1, 1]} : vector<1x256xf32> to vector<1x64xf32>
    %136 = vector.extract_strided_slice %133 {offsets = [0, 128], sizes = [1, 64], strides = [1, 1]} : vector<1x256xf32> to vector<1x64xf32>
    %cst_58 = arith.constant 2.000000e+00 : f32
    %137 = vector.broadcast %cst_58 : f32 to vector<1x64xf32>
    %138 = arith.mulf %137, %136 : vector<1x64xf32>
    %cst_59 = arith.constant 1.000000e+00 : f32
    %139 = vector.broadcast %cst_59 : f32 to vector<1x64xf32>
    %140 = arith.subf %138, %139 : vector<1x64xf32>
    %141 = vector.extract_strided_slice %133 {offsets = [0, 192], sizes = [1, 64], strides = [1, 1]} : vector<1x256xf32> to vector<1x64xf32>
    %142 = arith.mulf %135, %98 : vector<1x64xf32>
    %143 = arith.mulf %134, %140 : vector<1x64xf32>
    %144 = arith.addf %142, %143 : vector<1x64xf32>
    %145 = math.tanh %144 : vector<1x64xf32>
    %146 = arith.mulf %141, %145 : vector<1x64xf32>
    %c0_60 = arith.constant 0 : index
    %c0_61 = arith.constant 0 : index
    %147 = vector.load %arg2[%c0_60, %c0_61] : memref<32x128xf32, #tpu.memory_space<vmem>>, vector<32x128xf32>
    %cst_62 = arith.constant dense<0.000000e+00> : vector<1x128xf32>
    %148 = tpu.matmul %121, %147, %cst_62 {dimension_numbers = #tpu.dot_dimension_numbers<[1], [0], [0], [1], [0, 0, 1, 1], [], []>} : vector<1x32xf32>, vector<32x128xf32>, vector<1x128xf32> -> vector<1x128xf32>
    %149 = arith.addf %4, %148 : vector<1x128xf32>
    %150 = arith.negf %149 : vector<1x128xf32>
    %151 = math.exp %150 : vector<1x128xf32>
    %cst_63 = arith.constant 1.000000e+00 : f32
    %152 = vector.broadcast %cst_63 : f32 to vector<1x128xf32>
    %153 = arith.addf %152, %151 : vector<1x128xf32>
    %154 = arith.divf %152, %153 : vector<1x128xf32>
    %155 = vector.extract_strided_slice %154 {offsets = [0, 0], sizes = [1, 32], strides = [1, 1]} : vector<1x128xf32> to vector<1x32xf32>
    %156 = vector.extract_strided_slice %154 {offsets = [0, 32], sizes = [1, 32], strides = [1, 1]} : vector<1x128xf32> to vector<1x32xf32>
    %157 = vector.extract_strided_slice %154 {offsets = [0, 64], sizes = [1, 32], strides = [1, 1]} : vector<1x128xf32> to vector<1x32xf32>
    %cst_64 = arith.constant 2.000000e+00 : f32
    %158 = vector.broadcast %cst_64 : f32 to vector<1x32xf32>
    %159 = arith.mulf %158, %157 : vector<1x32xf32>
    %cst_65 = arith.constant 1.000000e+00 : f32
    %160 = vector.broadcast %cst_65 : f32 to vector<1x32xf32>
    %161 = arith.subf %159, %160 : vector<1x32xf32>
    %162 = vector.extract_strided_slice %154 {offsets = [0, 96], sizes = [1, 32], strides = [1, 1]} : vector<1x128xf32> to vector<1x32xf32>
    %163 = arith.mulf %156, %119 : vector<1x32xf32>
    %164 = arith.mulf %155, %161 : vector<1x32xf32>
    %165 = arith.addf %163, %164 : vector<1x32xf32>
    %166 = math.tanh %165 : vector<1x32xf32>
    %167 = arith.mulf %162, %166 : vector<1x32xf32>
    %c0_66 = arith.constant 0 : index
    %c0_67 = arith.constant 0 : index
    %168 = vector.load %arg4[%c0_66, %c0_67] : memref<32x256xf32, #tpu.memory_space<vmem>>, vector<32x256xf32>
    %cst_68 = arith.constant dense<0.000000e+00> : vector<1x256xf32>
    %169 = tpu.matmul %167, %168, %cst_68 {dimension_numbers = #tpu.dot_dimension_numbers<[1], [0], [0], [1], [0, 0, 1, 1], [], []>} : vector<1x32xf32>, vector<32x256xf32>, vector<1x256xf32> -> vector<1x256xf32>
    %c0_69 = arith.constant 0 : index
    %c0_70 = arith.constant 0 : index
    %170 = vector.load %arg5[%c0_69, %c0_70] : memref<64x256xf32, #tpu.memory_space<vmem>>, vector<64x256xf32>
    %cst_71 = arith.constant dense<0.000000e+00> : vector<1x256xf32>
    %171 = tpu.matmul %146, %170, %cst_71 {dimension_numbers = #tpu.dot_dimension_numbers<[1], [0], [0], [1], [0, 0, 1, 1], [], []>} : vector<1x64xf32>, vector<64x256xf32>, vector<1x256xf32> -> vector<1x256xf32>
    %172 = arith.addf %169, %171 : vector<1x256xf32>
    %c0_72 = arith.constant 0 : index
    %c0_73 = arith.constant 0 : index
    %173 = vector.load %arg6[%c0_72, %c0_73] : memref<1x256xf32, #tpu.memory_space<vmem>>, vector<1x256xf32>
    %174 = arith.addf %172, %173 : vector<1x256xf32>
    %175 = arith.negf %174 : vector<1x256xf32>
    %176 = math.exp %175 : vector<1x256xf32>
    %cst_74 = arith.constant 1.000000e+00 : f32
    %177 = vector.broadcast %cst_74 : f32 to vector<1x256xf32>
    %178 = arith.addf %177, %176 : vector<1x256xf32>
    %179 = arith.divf %177, %178 : vector<1x256xf32>
    %180 = vector.extract_strided_slice %179 {offsets = [0, 0], sizes = [1, 64], strides = [1, 1]} : vector<1x256xf32> to vector<1x64xf32>
    %181 = vector.extract_strided_slice %179 {offsets = [0, 64], sizes = [1, 64], strides = [1, 1]} : vector<1x256xf32> to vector<1x64xf32>
    %182 = vector.extract_strided_slice %179 {offsets = [0, 128], sizes = [1, 64], strides = [1, 1]} : vector<1x256xf32> to vector<1x64xf32>
    %cst_75 = arith.constant 2.000000e+00 : f32
    %183 = vector.broadcast %cst_75 : f32 to vector<1x64xf32>
    %184 = arith.mulf %183, %182 : vector<1x64xf32>
    %cst_76 = arith.constant 1.000000e+00 : f32
    %185 = vector.broadcast %cst_76 : f32 to vector<1x64xf32>
    %186 = arith.subf %184, %185 : vector<1x64xf32>
    %187 = vector.extract_strided_slice %179 {offsets = [0, 192], sizes = [1, 64], strides = [1, 1]} : vector<1x256xf32> to vector<1x64xf32>
    %188 = arith.mulf %181, %144 : vector<1x64xf32>
    %189 = arith.mulf %180, %186 : vector<1x64xf32>
    %190 = arith.addf %188, %189 : vector<1x64xf32>
    %191 = math.tanh %190 : vector<1x64xf32>
    %192 = arith.mulf %187, %191 : vector<1x64xf32>
    %c0_77 = arith.constant 0 : index
    %c0_78 = arith.constant 0 : index
    %193 = vector.load %arg2[%c0_77, %c0_78] : memref<32x128xf32, #tpu.memory_space<vmem>>, vector<32x128xf32>
    %cst_79 = arith.constant dense<0.000000e+00> : vector<1x128xf32>
    %194 = tpu.matmul %167, %193, %cst_79 {dimension_numbers = #tpu.dot_dimension_numbers<[1], [0], [0], [1], [0, 0, 1, 1], [], []>} : vector<1x32xf32>, vector<32x128xf32>, vector<1x128xf32> -> vector<1x128xf32>
    %195 = arith.addf %4, %194 : vector<1x128xf32>
    %196 = arith.negf %195 : vector<1x128xf32>
    %197 = math.exp %196 : vector<1x128xf32>
    %cst_80 = arith.constant 1.000000e+00 : f32
    %198 = vector.broadcast %cst_80 : f32 to vector<1x128xf32>
    %199 = arith.addf %198, %197 : vector<1x128xf32>
    %200 = arith.divf %198, %199 : vector<1x128xf32>
    %201 = vector.extract_strided_slice %200 {offsets = [0, 0], sizes = [1, 32], strides = [1, 1]} : vector<1x128xf32> to vector<1x32xf32>
    %202 = vector.extract_strided_slice %200 {offsets = [0, 32], sizes = [1, 32], strides = [1, 1]} : vector<1x128xf32> to vector<1x32xf32>
    %203 = vector.extract_strided_slice %200 {offsets = [0, 64], sizes = [1, 32], strides = [1, 1]} : vector<1x128xf32> to vector<1x32xf32>
    %cst_81 = arith.constant 2.000000e+00 : f32
    %204 = vector.broadcast %cst_81 : f32 to vector<1x32xf32>
    %205 = arith.mulf %204, %203 : vector<1x32xf32>
    %cst_82 = arith.constant 1.000000e+00 : f32
    %206 = vector.broadcast %cst_82 : f32 to vector<1x32xf32>
    %207 = arith.subf %205, %206 : vector<1x32xf32>
    %208 = vector.extract_strided_slice %200 {offsets = [0, 96], sizes = [1, 32], strides = [1, 1]} : vector<1x128xf32> to vector<1x32xf32>
    %209 = arith.mulf %202, %165 : vector<1x32xf32>
    %210 = arith.mulf %201, %207 : vector<1x32xf32>
    %211 = arith.addf %209, %210 : vector<1x32xf32>
    %212 = math.tanh %211 : vector<1x32xf32>
    %213 = arith.mulf %208, %212 : vector<1x32xf32>
    %c0_83 = arith.constant 0 : index
    %c0_84 = arith.constant 0 : index
    %214 = vector.load %arg4[%c0_83, %c0_84] : memref<32x256xf32, #tpu.memory_space<vmem>>, vector<32x256xf32>
    %cst_85 = arith.constant dense<0.000000e+00> : vector<1x256xf32>
    %215 = tpu.matmul %213, %214, %cst_85 {dimension_numbers = #tpu.dot_dimension_numbers<[1], [0], [0], [1], [0, 0, 1, 1], [], []>} : vector<1x32xf32>, vector<32x256xf32>, vector<1x256xf32> -> vector<1x256xf32>
    %c0_86 = arith.constant 0 : index
    %c0_87 = arith.constant 0 : index
    %216 = vector.load %arg5[%c0_86, %c0_87] : memref<64x256xf32, #tpu.memory_space<vmem>>, vector<64x256xf32>
    %cst_88 = arith.constant dense<0.000000e+00> : vector<1x256xf32>
    %217 = tpu.matmul %192, %216, %cst_88 {dimension_numbers = #tpu.dot_dimension_numbers<[1], [0], [0], [1], [0, 0, 1, 1], [], []>} : vector<1x64xf32>, vector<64x256xf32>, vector<1x256xf32> -> vector<1x256xf32>
    %218 = arith.addf %215, %217 : vector<1x256xf32>
    %c0_89 = arith.constant 0 : index
    %c0_90 = arith.constant 0 : index
    %219 = vector.load %arg6[%c0_89, %c0_90] : memref<1x256xf32, #tpu.memory_space<vmem>>, vector<1x256xf32>
    %220 = arith.addf %218, %219 : vector<1x256xf32>
    %221 = arith.negf %220 : vector<1x256xf32>
    %222 = math.exp %221 : vector<1x256xf32>
    %cst_91 = arith.constant 1.000000e+00 : f32
    %223 = vector.broadcast %cst_91 : f32 to vector<1x256xf32>
    %224 = arith.addf %223, %222 : vector<1x256xf32>
    %225 = arith.divf %223, %224 : vector<1x256xf32>
    %226 = vector.extract_strided_slice %225 {offsets = [0, 0], sizes = [1, 64], strides = [1, 1]} : vector<1x256xf32> to vector<1x64xf32>
    %227 = vector.extract_strided_slice %225 {offsets = [0, 64], sizes = [1, 64], strides = [1, 1]} : vector<1x256xf32> to vector<1x64xf32>
    %228 = vector.extract_strided_slice %225 {offsets = [0, 128], sizes = [1, 64], strides = [1, 1]} : vector<1x256xf32> to vector<1x64xf32>
    %cst_92 = arith.constant 2.000000e+00 : f32
    %229 = vector.broadcast %cst_92 : f32 to vector<1x64xf32>
    %230 = arith.mulf %229, %228 : vector<1x64xf32>
    %cst_93 = arith.constant 1.000000e+00 : f32
    %231 = vector.broadcast %cst_93 : f32 to vector<1x64xf32>
    %232 = arith.subf %230, %231 : vector<1x64xf32>
    %233 = vector.extract_strided_slice %225 {offsets = [0, 192], sizes = [1, 64], strides = [1, 1]} : vector<1x256xf32> to vector<1x64xf32>
    %234 = arith.mulf %227, %190 : vector<1x64xf32>
    %235 = arith.mulf %226, %232 : vector<1x64xf32>
    %236 = arith.addf %234, %235 : vector<1x64xf32>
    %237 = math.tanh %236 : vector<1x64xf32>
    %238 = arith.mulf %233, %237 : vector<1x64xf32>
    %c0_94 = arith.constant 0 : index
    %c0_95 = arith.constant 0 : index
    %239 = vector.load %arg2[%c0_94, %c0_95] : memref<32x128xf32, #tpu.memory_space<vmem>>, vector<32x128xf32>
    %cst_96 = arith.constant dense<0.000000e+00> : vector<1x128xf32>
    %240 = tpu.matmul %213, %239, %cst_96 {dimension_numbers = #tpu.dot_dimension_numbers<[1], [0], [0], [1], [0, 0, 1, 1], [], []>} : vector<1x32xf32>, vector<32x128xf32>, vector<1x128xf32> -> vector<1x128xf32>
    %241 = arith.addf %4, %240 : vector<1x128xf32>
    %242 = arith.negf %241 : vector<1x128xf32>
    %243 = math.exp %242 : vector<1x128xf32>
    %cst_97 = arith.constant 1.000000e+00 : f32
    %244 = vector.broadcast %cst_97 : f32 to vector<1x128xf32>
    %245 = arith.addf %244, %243 : vector<1x128xf32>
    %246 = arith.divf %244, %245 : vector<1x128xf32>
    %247 = vector.extract_strided_slice %246 {offsets = [0, 0], sizes = [1, 32], strides = [1, 1]} : vector<1x128xf32> to vector<1x32xf32>
    %248 = vector.extract_strided_slice %246 {offsets = [0, 32], sizes = [1, 32], strides = [1, 1]} : vector<1x128xf32> to vector<1x32xf32>
    %249 = vector.extract_strided_slice %246 {offsets = [0, 64], sizes = [1, 32], strides = [1, 1]} : vector<1x128xf32> to vector<1x32xf32>
    %cst_98 = arith.constant 2.000000e+00 : f32
    %250 = vector.broadcast %cst_98 : f32 to vector<1x32xf32>
    %251 = arith.mulf %250, %249 : vector<1x32xf32>
    %cst_99 = arith.constant 1.000000e+00 : f32
    %252 = vector.broadcast %cst_99 : f32 to vector<1x32xf32>
    %253 = arith.subf %251, %252 : vector<1x32xf32>
    %254 = vector.extract_strided_slice %246 {offsets = [0, 96], sizes = [1, 32], strides = [1, 1]} : vector<1x128xf32> to vector<1x32xf32>
    %255 = arith.mulf %248, %211 : vector<1x32xf32>
    %256 = arith.mulf %247, %253 : vector<1x32xf32>
    %257 = arith.addf %255, %256 : vector<1x32xf32>
    %258 = math.tanh %257 : vector<1x32xf32>
    %259 = arith.mulf %254, %258 : vector<1x32xf32>
    %c0_100 = arith.constant 0 : index
    %c0_101 = arith.constant 0 : index
    %260 = vector.load %arg4[%c0_100, %c0_101] : memref<32x256xf32, #tpu.memory_space<vmem>>, vector<32x256xf32>
    %cst_102 = arith.constant dense<0.000000e+00> : vector<1x256xf32>
    %261 = tpu.matmul %259, %260, %cst_102 {dimension_numbers = #tpu.dot_dimension_numbers<[1], [0], [0], [1], [0, 0, 1, 1], [], []>} : vector<1x32xf32>, vector<32x256xf32>, vector<1x256xf32> -> vector<1x256xf32>
    %c0_103 = arith.constant 0 : index
    %c0_104 = arith.constant 0 : index
    %262 = vector.load %arg5[%c0_103, %c0_104] : memref<64x256xf32, #tpu.memory_space<vmem>>, vector<64x256xf32>
    %cst_105 = arith.constant dense<0.000000e+00> : vector<1x256xf32>
    %263 = tpu.matmul %238, %262, %cst_105 {dimension_numbers = #tpu.dot_dimension_numbers<[1], [0], [0], [1], [0, 0, 1, 1], [], []>} : vector<1x64xf32>, vector<64x256xf32>, vector<1x256xf32> -> vector<1x256xf32>
    %264 = arith.addf %261, %263 : vector<1x256xf32>
    %c0_106 = arith.constant 0 : index
    %c0_107 = arith.constant 0 : index
    %265 = vector.load %arg6[%c0_106, %c0_107] : memref<1x256xf32, #tpu.memory_space<vmem>>, vector<1x256xf32>
    %266 = arith.addf %264, %265 : vector<1x256xf32>
    %267 = arith.negf %266 : vector<1x256xf32>
    %268 = math.exp %267 : vector<1x256xf32>
    %cst_108 = arith.constant 1.000000e+00 : f32
    %269 = vector.broadcast %cst_108 : f32 to vector<1x256xf32>
    %270 = arith.addf %269, %268 : vector<1x256xf32>
    %271 = arith.divf %269, %270 : vector<1x256xf32>
    %272 = vector.extract_strided_slice %271 {offsets = [0, 0], sizes = [1, 64], strides = [1, 1]} : vector<1x256xf32> to vector<1x64xf32>
    %273 = vector.extract_strided_slice %271 {offsets = [0, 64], sizes = [1, 64], strides = [1, 1]} : vector<1x256xf32> to vector<1x64xf32>
    %274 = vector.extract_strided_slice %271 {offsets = [0, 128], sizes = [1, 64], strides = [1, 1]} : vector<1x256xf32> to vector<1x64xf32>
    %cst_109 = arith.constant 2.000000e+00 : f32
    %275 = vector.broadcast %cst_109 : f32 to vector<1x64xf32>
    %276 = arith.mulf %275, %274 : vector<1x64xf32>
    %cst_110 = arith.constant 1.000000e+00 : f32
    %277 = vector.broadcast %cst_110 : f32 to vector<1x64xf32>
    %278 = arith.subf %276, %277 : vector<1x64xf32>
    %279 = vector.extract_strided_slice %271 {offsets = [0, 192], sizes = [1, 64], strides = [1, 1]} : vector<1x256xf32> to vector<1x64xf32>
    %280 = arith.mulf %273, %236 : vector<1x64xf32>
    %281 = arith.mulf %272, %278 : vector<1x64xf32>
    %282 = arith.addf %280, %281 : vector<1x64xf32>
    %283 = math.tanh %282 : vector<1x64xf32>
    %284 = arith.mulf %279, %283 : vector<1x64xf32>
    %c0_111 = arith.constant 0 : index
    %c0_112 = arith.constant 0 : index
    %285 = vector.load %arg2[%c0_111, %c0_112] : memref<32x128xf32, #tpu.memory_space<vmem>>, vector<32x128xf32>
    %cst_113 = arith.constant dense<0.000000e+00> : vector<1x128xf32>
    %286 = tpu.matmul %259, %285, %cst_113 {dimension_numbers = #tpu.dot_dimension_numbers<[1], [0], [0], [1], [0, 0, 1, 1], [], []>} : vector<1x32xf32>, vector<32x128xf32>, vector<1x128xf32> -> vector<1x128xf32>
    %287 = arith.addf %4, %286 : vector<1x128xf32>
    %288 = arith.negf %287 : vector<1x128xf32>
    %289 = math.exp %288 : vector<1x128xf32>
    %cst_114 = arith.constant 1.000000e+00 : f32
    %290 = vector.broadcast %cst_114 : f32 to vector<1x128xf32>
    %291 = arith.addf %290, %289 : vector<1x128xf32>
    %292 = arith.divf %290, %291 : vector<1x128xf32>
    %293 = vector.extract_strided_slice %292 {offsets = [0, 0], sizes = [1, 32], strides = [1, 1]} : vector<1x128xf32> to vector<1x32xf32>
    %294 = vector.extract_strided_slice %292 {offsets = [0, 32], sizes = [1, 32], strides = [1, 1]} : vector<1x128xf32> to vector<1x32xf32>
    %295 = vector.extract_strided_slice %292 {offsets = [0, 64], sizes = [1, 32], strides = [1, 1]} : vector<1x128xf32> to vector<1x32xf32>
    %cst_115 = arith.constant 2.000000e+00 : f32
    %296 = vector.broadcast %cst_115 : f32 to vector<1x32xf32>
    %297 = arith.mulf %296, %295 : vector<1x32xf32>
    %cst_116 = arith.constant 1.000000e+00 : f32
    %298 = vector.broadcast %cst_116 : f32 to vector<1x32xf32>
    %299 = arith.subf %297, %298 : vector<1x32xf32>
    %300 = vector.extract_strided_slice %292 {offsets = [0, 96], sizes = [1, 32], strides = [1, 1]} : vector<1x128xf32> to vector<1x32xf32>
    %301 = arith.mulf %294, %257 : vector<1x32xf32>
    %302 = arith.mulf %293, %299 : vector<1x32xf32>
    %303 = arith.addf %301, %302 : vector<1x32xf32>
    %304 = math.tanh %303 : vector<1x32xf32>
    %305 = arith.mulf %300, %304 : vector<1x32xf32>
    %c0_117 = arith.constant 0 : index
    %c0_118 = arith.constant 0 : index
    %306 = vector.load %arg4[%c0_117, %c0_118] : memref<32x256xf32, #tpu.memory_space<vmem>>, vector<32x256xf32>
    %cst_119 = arith.constant dense<0.000000e+00> : vector<1x256xf32>
    %307 = tpu.matmul %305, %306, %cst_119 {dimension_numbers = #tpu.dot_dimension_numbers<[1], [0], [0], [1], [0, 0, 1, 1], [], []>} : vector<1x32xf32>, vector<32x256xf32>, vector<1x256xf32> -> vector<1x256xf32>
    %c0_120 = arith.constant 0 : index
    %c0_121 = arith.constant 0 : index
    %308 = vector.load %arg5[%c0_120, %c0_121] : memref<64x256xf32, #tpu.memory_space<vmem>>, vector<64x256xf32>
    %cst_122 = arith.constant dense<0.000000e+00> : vector<1x256xf32>
    %309 = tpu.matmul %284, %308, %cst_122 {dimension_numbers = #tpu.dot_dimension_numbers<[1], [0], [0], [1], [0, 0, 1, 1], [], []>} : vector<1x64xf32>, vector<64x256xf32>, vector<1x256xf32> -> vector<1x256xf32>
    %310 = arith.addf %307, %309 : vector<1x256xf32>
    %c0_123 = arith.constant 0 : index
    %c0_124 = arith.constant 0 : index
    %311 = vector.load %arg6[%c0_123, %c0_124] : memref<1x256xf32, #tpu.memory_space<vmem>>, vector<1x256xf32>
    %312 = arith.addf %310, %311 : vector<1x256xf32>
    %313 = arith.negf %312 : vector<1x256xf32>
    %314 = math.exp %313 : vector<1x256xf32>
    %cst_125 = arith.constant 1.000000e+00 : f32
    %315 = vector.broadcast %cst_125 : f32 to vector<1x256xf32>
    %316 = arith.addf %315, %314 : vector<1x256xf32>
    %317 = arith.divf %315, %316 : vector<1x256xf32>
    %318 = vector.extract_strided_slice %317 {offsets = [0, 0], sizes = [1, 64], strides = [1, 1]} : vector<1x256xf32> to vector<1x64xf32>
    %319 = vector.extract_strided_slice %317 {offsets = [0, 64], sizes = [1, 64], strides = [1, 1]} : vector<1x256xf32> to vector<1x64xf32>
    %320 = vector.extract_strided_slice %317 {offsets = [0, 128], sizes = [1, 64], strides = [1, 1]} : vector<1x256xf32> to vector<1x64xf32>
    %cst_126 = arith.constant 2.000000e+00 : f32
    %321 = vector.broadcast %cst_126 : f32 to vector<1x64xf32>
    %322 = arith.mulf %321, %320 : vector<1x64xf32>
    %cst_127 = arith.constant 1.000000e+00 : f32
    %323 = vector.broadcast %cst_127 : f32 to vector<1x64xf32>
    %324 = arith.subf %322, %323 : vector<1x64xf32>
    %325 = vector.extract_strided_slice %317 {offsets = [0, 192], sizes = [1, 64], strides = [1, 1]} : vector<1x256xf32> to vector<1x64xf32>
    %326 = arith.mulf %319, %282 : vector<1x64xf32>
    %327 = arith.mulf %318, %324 : vector<1x64xf32>
    %328 = arith.addf %326, %327 : vector<1x64xf32>
    %329 = math.tanh %328 : vector<1x64xf32>
    %330 = arith.mulf %325, %329 : vector<1x64xf32>
    %c0_128 = arith.constant 0 : index
    %c0_129 = arith.constant 0 : index
    %331 = vector.load %arg2[%c0_128, %c0_129] : memref<32x128xf32, #tpu.memory_space<vmem>>, vector<32x128xf32>
    %cst_130 = arith.constant dense<0.000000e+00> : vector<1x128xf32>
    %332 = tpu.matmul %305, %331, %cst_130 {dimension_numbers = #tpu.dot_dimension_numbers<[1], [0], [0], [1], [0, 0, 1, 1], [], []>} : vector<1x32xf32>, vector<32x128xf32>, vector<1x128xf32> -> vector<1x128xf32>
    %333 = arith.addf %4, %332 : vector<1x128xf32>
    %334 = arith.negf %333 : vector<1x128xf32>
    %335 = math.exp %334 : vector<1x128xf32>
    %cst_131 = arith.constant 1.000000e+00 : f32
    %336 = vector.broadcast %cst_131 : f32 to vector<1x128xf32>
    %337 = arith.addf %336, %335 : vector<1x128xf32>
    %338 = arith.divf %336, %337 : vector<1x128xf32>
    %339 = vector.extract_strided_slice %338 {offsets = [0, 0], sizes = [1, 32], strides = [1, 1]} : vector<1x128xf32> to vector<1x32xf32>
    %340 = vector.extract_strided_slice %338 {offsets = [0, 32], sizes = [1, 32], strides = [1, 1]} : vector<1x128xf32> to vector<1x32xf32>
    %341 = vector.extract_strided_slice %338 {offsets = [0, 64], sizes = [1, 32], strides = [1, 1]} : vector<1x128xf32> to vector<1x32xf32>
    %cst_132 = arith.constant 2.000000e+00 : f32
    %342 = vector.broadcast %cst_132 : f32 to vector<1x32xf32>
    %343 = arith.mulf %342, %341 : vector<1x32xf32>
    %cst_133 = arith.constant 1.000000e+00 : f32
    %344 = vector.broadcast %cst_133 : f32 to vector<1x32xf32>
    %345 = arith.subf %343, %344 : vector<1x32xf32>
    %346 = vector.extract_strided_slice %338 {offsets = [0, 96], sizes = [1, 32], strides = [1, 1]} : vector<1x128xf32> to vector<1x32xf32>
    %347 = arith.mulf %340, %303 : vector<1x32xf32>
    %348 = arith.mulf %339, %345 : vector<1x32xf32>
    %349 = arith.addf %347, %348 : vector<1x32xf32>
    %350 = math.tanh %349 : vector<1x32xf32>
    %351 = arith.mulf %346, %350 : vector<1x32xf32>
    %c0_134 = arith.constant 0 : index
    %c0_135 = arith.constant 0 : index
    %352 = vector.load %arg4[%c0_134, %c0_135] : memref<32x256xf32, #tpu.memory_space<vmem>>, vector<32x256xf32>
    %cst_136 = arith.constant dense<0.000000e+00> : vector<1x256xf32>
    %353 = tpu.matmul %351, %352, %cst_136 {dimension_numbers = #tpu.dot_dimension_numbers<[1], [0], [0], [1], [0, 0, 1, 1], [], []>} : vector<1x32xf32>, vector<32x256xf32>, vector<1x256xf32> -> vector<1x256xf32>
    %c0_137 = arith.constant 0 : index
    %c0_138 = arith.constant 0 : index
    %354 = vector.load %arg5[%c0_137, %c0_138] : memref<64x256xf32, #tpu.memory_space<vmem>>, vector<64x256xf32>
    %cst_139 = arith.constant dense<0.000000e+00> : vector<1x256xf32>
    %355 = tpu.matmul %330, %354, %cst_139 {dimension_numbers = #tpu.dot_dimension_numbers<[1], [0], [0], [1], [0, 0, 1, 1], [], []>} : vector<1x64xf32>, vector<64x256xf32>, vector<1x256xf32> -> vector<1x256xf32>
    %356 = arith.addf %353, %355 : vector<1x256xf32>
    %c0_140 = arith.constant 0 : index
    %c0_141 = arith.constant 0 : index
    %357 = vector.load %arg6[%c0_140, %c0_141] : memref<1x256xf32, #tpu.memory_space<vmem>>, vector<1x256xf32>
    %358 = arith.addf %356, %357 : vector<1x256xf32>
    %359 = arith.negf %358 : vector<1x256xf32>
    %360 = math.exp %359 : vector<1x256xf32>
    %cst_142 = arith.constant 1.000000e+00 : f32
    %361 = vector.broadcast %cst_142 : f32 to vector<1x256xf32>
    %362 = arith.addf %361, %360 : vector<1x256xf32>
    %363 = arith.divf %361, %362 : vector<1x256xf32>
    %364 = vector.extract_strided_slice %363 {offsets = [0, 0], sizes = [1, 64], strides = [1, 1]} : vector<1x256xf32> to vector<1x64xf32>
    %365 = vector.extract_strided_slice %363 {offsets = [0, 64], sizes = [1, 64], strides = [1, 1]} : vector<1x256xf32> to vector<1x64xf32>
    %366 = vector.extract_strided_slice %363 {offsets = [0, 128], sizes = [1, 64], strides = [1, 1]} : vector<1x256xf32> to vector<1x64xf32>
    %cst_143 = arith.constant 2.000000e+00 : f32
    %367 = vector.broadcast %cst_143 : f32 to vector<1x64xf32>
    %368 = arith.mulf %367, %366 : vector<1x64xf32>
    %cst_144 = arith.constant 1.000000e+00 : f32
    %369 = vector.broadcast %cst_144 : f32 to vector<1x64xf32>
    %370 = arith.subf %368, %369 : vector<1x64xf32>
    %371 = vector.extract_strided_slice %363 {offsets = [0, 192], sizes = [1, 64], strides = [1, 1]} : vector<1x256xf32> to vector<1x64xf32>
    %372 = arith.mulf %365, %328 : vector<1x64xf32>
    %373 = arith.mulf %364, %370 : vector<1x64xf32>
    %374 = arith.addf %372, %373 : vector<1x64xf32>
    %375 = math.tanh %374 : vector<1x64xf32>
    %376 = arith.mulf %371, %375 : vector<1x64xf32>
    %377 = tpu.concatenate %54, %100, %146, %192, %238, %284, %330, %376 in 0 : vector<1x64xf32>, vector<1x64xf32>, vector<1x64xf32>, vector<1x64xf32>, vector<1x64xf32>, vector<1x64xf32>, vector<1x64xf32>, vector<1x64xf32> -> vector<8x64xf32>
    %c0_145 = arith.constant 0 : index
    %c0_146 = arith.constant 0 : index
    %378 = vector.load %arg7[%c0_145, %c0_146] : memref<64x1xf32, #tpu.memory_space<vmem>>, vector<64x1xf32>
    %cst_147 = arith.constant dense<0.000000e+00> : vector<8x1xf32>
    %379 = tpu.matmul %377, %378, %cst_147 {dimension_numbers = #tpu.dot_dimension_numbers<[1], [0], [0], [1], [0, 0, 1, 1], [], []>} : vector<8x64xf32>, vector<64x1xf32>, vector<8x1xf32> -> vector<8x1xf32>
    %c0_148 = arith.constant 0 : index
    %c0_149 = arith.constant 0 : index
    %380 = vector.load %arg8[%c0_148, %c0_149] : memref<1x1xf32, #tpu.memory_space<vmem>>, vector<1x1xf32>
    %381 = vector.broadcast %380 : vector<1x1xf32> to vector<8x1xf32>
    %382 = arith.addf %379, %381 : vector<8x1xf32>
    %c0_150 = arith.constant 0 : index
    %c0_151 = arith.constant 0 : index
    %383 = vector.load %arg9[%c0_150, %c0_151] : memref<8x1xf32, #tpu.memory_space<vmem>>, vector<8x1xf32>
    tpu.vector_store %arg9[%c0_150, %c0_151], %382 {strides = array<i32>} : memref<8x1xf32, #tpu.memory_space<vmem>>, vector<8x1xf32>,
    return
  }
}

</mosaic_0001>

<bundles_post_ra>
// kernel: tpu_custom_call.1
= control target key start
LH: loop header
LB: loop body
LE: loop exit
PB: predicated region body
PF: predicated region fallthrough
CT: control target
= control target key end

     0   :  { %s3759_s0 = inlined_call_operand.vmem [shape: f32[1,32], index: 0, kind: input, shape index: {}]   ;;  %s3760_s1 = inlined_call_operand.hbm [shape: f32[32,128], index: 1, kind: input, shape index: {}]   ;;  %s3761_s2 = inlined_call_operand.hbm [shape: f32[32,128], index: 2, kind: input, shape index: {}]   ;;  %s3762_s3 = inlined_call_operand.vmem [shape: f32[1,128], index: 3, kind: input, shape index: {}]   ;;  %s3763_s4 = inlined_call_operand.vmem [shape: f32[32,256], index: 4, kind: input, shape index: {}]   ;;  %s3764_s5 = inlined_call_operand.hbm [shape: f32[64,256], index: 5, kind: input, shape index: {}]   ;;  %s3765_s6 = inlined_call_operand.vmem [shape: f32[1,256], index: 6, kind: input, shape index: {}]   ;;  %s3766_s7 = inlined_call_operand.vmem [shape: f32[64,1], index: 7, kind: input, shape index: {}]   ;;  %s3767_s8 = inlined_call_operand.<no memory space> [shape: f32[1,1], index: 8, kind: input, shape index: {}]   ;;  %s3768_s9 = inlined_call_operand.vmem [shape: f32[8,1], index: 9, kind: output, shape index: {}]  }
   0x1   :  { %v14_v0 = vstv %s3767_s8 }
   0x2   :  { %15 = vst [vmem:[#allocation2] sm:$0x1] %v14_v0 }
   0x3   :  { %16 = vsyncpa [#allocation4], 0 }
   0x4   :  { %17 = vsyncpa [#allocation6], 0  ;;  %s2975_s11 = smov [#allocation5]   ;;  %s2976_s13 = smov [#allocation3]  }
   0x5   :  { %s37_s12 = sshll.u32 %s2975_s11, 4  ;;  %s25_s14 = sshll.u32 %s2976_s13, 4  ;;  %s38_s12 = int_to_ptr.vmem [resolvable:$true] %s37_s12  ;;  %s26_s14 = int_to_ptr.vmem [resolvable:$true] %s25_s14 }
   0x6   :  { %s2919_s15 = scalar_lea.vmem %s38_s12, 512  ;;  %p2924_p1 = scmp.lt.s32.totalorder %s38_s12, %s38_s12 }
   0x7   :  { %p2920_p0 = scmp.ne.s32.totalorder %s38_s12, %s2919_s15  ;;  %p2925_p2 = scmp.lt.s32.totalorder %s2919_s15, %s2919_s15 }
   0x9   :  { %p2926_p3 = por %p2925_p2, %p2924_p1 }
   0xb   :  { %p2927_p4 = pnand %p2926_p3, %p2920_p0 }
   0xd   :  { %2930 = shalt.err (!%p2927_p4)
}
   0xe   :  { %s2977_s16 = smov 128   ;;  %s2978_s17 = smov 8  }
   0xf   :  { %43 = dma.hbm_to_vmem [thread:$0]  %s3761_s2, 512, %s38_s12, [#allocation6], %s2977_s16, %s2977_s16, %s2978_s17  }
  0x10   :  { %s2939_s19 = scalar_lea.vmem %s26_s14, 512  ;;  %p2944_p6 = scmp.lt.s32.totalorder %s26_s14, %s26_s14 }
  0x11   :  { %p2940_p5 = scmp.ne.s32.totalorder %s26_s14, %s2939_s19  ;;  %p2945_p7 = scmp.lt.s32.totalorder %s2939_s19, %s2939_s19 }
  0x13   :  { %p2946_p8 = por %p2945_p7, %p2944_p6 }
  0x15   :  { %p2947_p9 = pnand %p2946_p8, %p2940_p5 }
  0x17   :  { %2950 = shalt.err (!%p2947_p9)
}
  0x18   :  { %31 = dma.hbm_to_vmem [thread:$0]  %s3760_s1, 512, %s26_s14, [#allocation4], %s2977_s16, %s2977_s16, %s2978_s17  }
  0x19   :  { %s2979_s22 = smov [#allocation7]  }
  0x1a   :  { %s53_s23 = sshll.u32 %s2979_s22, 4  ;;  %s54_s23 = int_to_ptr.vmem [resolvable:$true] %s53_s23 }
  0x1b   :  { %s2959_s24 = scalar_lea.vmem %s54_s23, 2048  ;;  %p2964_p11 = scmp.lt.s32.totalorder %s54_s23, %s54_s23 }
  0x1c   :  { %p2960_p10 = scmp.ne.s32.totalorder %s54_s23, %s2959_s24  ;;  %p2965_p12 = scmp.lt.s32.totalorder %s2959_s24, %s2959_s24 }
  0x1e   :  { %p2966_p13 = por %p2965_p12, %p2964_p11 }
  0x20   :  { %p2967_p0 = pnand %p2966_p13, %p2960_p10 }
  0x22   :  { %2970 = shalt.err (!%p2967_p0)
}
  0x23   :  { %s2980_s2 = smov 256   ;;  %s2981_s25 = smov 16  }
  0x24   :  { %59 = dma.hbm_to_vmem [thread:$0]  %s3764_s5, 2048, %s54_s23, [#allocation6], %s2980_s2, %s2980_s2, %s2981_s25  }
  0x25   :  { %2971 = dma.done.wait [#allocation4], 512  }
  0x26   :  { %2972 = vsyncadd [#allocation4], 4294966784 }
  0x27   :  { %2973 = dma.done.wait [#allocation6], 2560  }
  0x28   :  { %2974 = vsyncadd [#allocation6], 4294964736  ;;  %v2982_v1 = vmov 0.0   ;;  %vm2983_vm0 = vmmov 0   ;;  %v79_v2 = vld [vmem:[#allocation3 + $0x18] sm:$0xff]  ;;  %v78_v4 = vld [vmem:[#allocation3 + $0x10] sm:$0xff] }
  0x29   :  { %2626 = vmatprep.subr.mxu0 %v2982_v1  ;;  %2637 = vmatprep.subr.mxu1 %v2982_v1  ;;  %v3054_v3 = vld [vmem:[#allocation5 + $0x18] sm:$0xff]  ;;  %v3057_v5 = vld [vmem:[#allocation5 + $0x10] sm:$0xff]  ;;  %v77_v6 = vld [vmem:[#allocation3 + $0x8] sm:$0xff]  ;;  %vm81_vm1 = vcmask 261120   ;;  %vm282_vm2 = vcmask 523264   ;;  %vm2395_vm3 = vcmask 1040384  }
  0x2a   :  { %2634 = vmatprep.mubr.msk.f32.mxu0 %vm2983_vm0, %v2982_v1  ;;  %2645 = vmatprep.mubr.msk.f32.mxu1 %vm2983_vm0, %v2982_v1  ;;  %v3061_v7 = vld [vmem:[#allocation5 + $0x8] sm:$0xff]  ;;  %v76_v8 = vld [vmem:[#allocation3] sm:$0xff]  ;;  %v75_v10 = vld [vmem:[%s3759_s0] sm:$0x1]  ;;  %s2984_s0 = smov 64   ;;  %vm2397_vm4 = vcmask 1041408  }
  0x2b   :  { %2627 = vmatpush3.msra.mxu0 %v79_v2  ;;  %2638 = vmatpush3.msra.mxu1 %v3054_v3  ;;  %v3066_v9 = vld [vmem:[#allocation5] sm:$0xff]  ;;  %v80_v11 = vld [vmem:[%s3762_s3] sm:$0x1]  ;;  %s2985_s3 = smov 32   ;;  %v3097_v30 = vld [vmem:[#allocation7 + $0x70] sm:$0xff]  ;;  %vm2399_vm5 = vcmask 1042432  }
  0x2c   :  { %2628 = vmatprep.subr.mxu0 %v2982_v1  ;;  %2639 = vmatprep.subr.mxu1 %v2982_v1  ;;  %v3095_v29 = vld [vmem:[#allocation7 + $0x78] sm:$0xff]  ;;  %v3099_v31 = vld [vmem:[#allocation7 + $0x68] sm:$0xff]  ;;  %v3102_v32 = vld [vmem:[#allocation7 + $0x60] sm:$0xff]  ;;  %vm2401_vm6 = vcmask 1043456   ;;  %vm2403_vm7 = vcmask 1044480   ;;  %vm2405_vm8 = vcmask 1045504  }
  0x2d   :  { %2629 = vmatpush3.msra.mxu0 %v78_v4  ;;  %2640 = vmatpush3.msra.mxu1 %v3057_v5  ;;  %v3105_v33 = vld [vmem:[#allocation7 + $0x58] sm:$0xff]  ;;  %v3113_v35 = vld [vmem:[#allocation7 + $0x50] sm:$0xff]  ;;  %v3122_v37 = vld [vmem:[#allocation7 + $0x48] sm:$0xff]  ;;  %vm2407_vm9 = vcmask 1046528   ;;  %vm2499_vm10 = vcmask 7168  }
  0x2e   :  { %2630 = vmatprep.subr.mxu0 %v2982_v1  ;;  %2641 = vmatprep.subr.mxu1 %v2982_v1  ;;  %v3110_v34 = vld [vmem:[%s3763_s4 + $0x38] sm:$0xff]  ;;  %v3119_v36 = vld [vmem:[%s3763_s4 + $0x30] sm:$0xff]  ;;  %v3128_v38 = vld [vmem:[%s3763_s4 + $0x28] sm:$0xff] }
  0x2f   :  { %2631 = vmatpush3.msra.mxu0 %v77_v6  ;;  %2642 = vmatpush3.msra.mxu1 %v3061_v7  ;;  %v3133_v39 = vld [vmem:[%s3763_s4 + $0x20] sm:$0xff]  ;;  %v3142_v41 = vld [vmem:[%s3763_s4 + $0x18] sm:$0xff]  ;;  %v3151_v43 = vld [vmem:[%s3763_s4 + $0x10] sm:$0xff] }
  0x30   :  { %2632 = vmatprep.subr.mxu0 %v2982_v1  ;;  %2643 = vmatprep.subr.mxu1 %v2982_v1  ;;  %v3136_v40 = vld [vmem:[#allocation7 + $0x40] sm:$0xff]  ;;  %v3145_v42 = vld [vmem:[#allocation7 + $0x38] sm:$0xff]  ;;  %v3159_v45 = vld [vmem:[#allocation7 + $0x30] sm:$0xff] }
  0x31   :  { %2633 = vmatpush3.msra.mxu0 %v76_v8  ;;  %2644 = vmatpush3.msra.mxu1 %v3066_v9  ;;  %v3156_v44 = vld [vmem:[%s3763_s4 + $0x8] sm:$0xff]  ;;  %v3165_v46 = vld [vmem:[%s3763_s4] sm:$0xff]  ;;  %v3181_v51 = vld [vmem:[#allocation7 + $0x10] sm:$0xff] }
  0x32   :  { %2635 = vmatmul.mubr.msk.f32.vlgmr.msra.gmra.mxu0 %vm81_vm1, %v75_v10  ;;  %2646 = vmatmul.mubr.f32.vlgmr.msra.gmra.mxu1 %v2982_v1  ;;  %v3168_v47 = vld [vmem:[#allocation7 + $0x28] sm:$0xff]  ;;  %v3172_v48 = vld [vmem:[#allocation7 + $0x20] sm:$0xff]  ;;  %v3176_v50 = vld [vmem:[#allocation7 + $0x18] sm:$0xff] }
  0x33   :  { %349 = vmatprep.mubr.f32.mxu0 %v2982_v1  ;;  %425 = vmatprep.mubr.f32.mxu1 %v2982_v1  ;;  %v3184_v52 = vld [vmem:[#allocation7 + $0x8] sm:$0xff]  ;;  %v3188_v53 = vld [vmem:[#allocation7] sm:$0xff] }
  0x34   :  { %301 = vmatprep.subr.mxu0 %v3095_v29  ;;  %385 = vmatprep.subr.mxu1 %v3110_v34 }
  0x35   :  { %302 = vmatpush1.msra.mxu0 %v3097_v30  ;;  %386 = vmatpush1.msra.mxu1 %v3119_v36 }
  0x36   :  { %303 = vmatprep.subr.mxu0 %v3099_v31  ;;  %387 = vmatprep.subr.mxu1 %v3128_v38 }
  0x37   :  { %304 = vmatpush1.msra.mxu0 %v3102_v32  ;;  %388 = vmatpush1.msra.mxu1 %v3133_v39 }
  0x38   :  { %305 = vmatprep.subr.mxu0 %v3105_v33  ;;  %389 = vmatprep.subr.mxu1 %v3142_v41 }
  0x39   :  { %306 = vmatpush1.msra.mxu0 %v3113_v35  ;;  %390 = vmatpush1.msra.mxu1 %v3151_v43 }
  0x3a   :  { %307 = vmatprep.subr.mxu0 %v3122_v37  ;;  %391 = vmatprep.subr.mxu1 %v3156_v44 }
  0x3b   :  { %308 = vmatpush1.msra.mxu0 %v3136_v40  ;;  %392 = vmatpush1.msra.mxu1 %v3165_v46 }
  0x3c   :  { %309 = vmatprep.subr.mxu0 %v3145_v42  ;;  %2648 = vmatprep.subr.mxu1 %v2982_v1 }
  0x3d   :  { %310 = vmatpush1.msra.mxu0 %v3159_v45 }
  0x3e   :  { %311 = vmatprep.subr.mxu0 %v3168_v47 }
  0x3f   :  { %312 = vmatpush1.msra.mxu0 %v3172_v48 }
  0x40   :  { %313 = vmatprep.subr.mxu0 %v3176_v50 }
  0x41   :  { %314 = vmatpush1.msra.mxu0 %v3181_v51 }
  0x42   :  { %315 = vmatprep.subr.mxu0 %v3184_v52 }
  0x43   :  { %316 = vmatpush1.msra.mxu0 %v3188_v53 }
  0x44   :  { %350 = vmatmul.mubr.f32.vlgmr.msra.gmra.mxu0 %v2982_v1  ;;  %586 = vmatprep.subr.mxu0 %v3095_v29 }
  0x45   :  { %587 = vmatpush1.msra.mxu0 %v3097_v30  ;;  %634 = vmatprep.mubr.f32.mxu0 %v2982_v1 }
  0x46   :  { %588 = vmatprep.subr.mxu0 %v3099_v31 }
  0x47   :  { %589 = vmatpush1.msra.mxu0 %v3102_v32 }
  0x48   :  { %590 = vmatprep.subr.mxu0 %v3105_v33 }
  0x49   :  { %591 = vmatpush1.msra.mxu0 %v3113_v35 }
  0x4a   :  { %592 = vmatprep.subr.mxu0 %v3122_v37 }
  0x4b   :  { %593 = vmatpush1.msra.mxu0 %v3136_v40 }
  0x4c   :  { %594 = vmatprep.subr.mxu0 %v3145_v42 }
  0x4d   :  { %595 = vmatpush1.msra.mxu0 %v3159_v45 }
  0x4e   :  { %596 = vmatprep.subr.mxu0 %v3168_v47 }
  0x4f   :  { %597 = vmatpush1.msra.mxu0 %v3172_v48 }
  0x50   :  { %598 = vmatprep.subr.mxu0 %v3176_v50 }
  0x51   :  { %599 = vmatpush1.msra.mxu0 %v3181_v51 }
  0x52   :  { %600 = vmatprep.subr.mxu0 %v3184_v52 }
  0x53   :  { %601 = vmatpush1.msra.mxu0 %v3188_v53 }
  0x54   :  { %859 = vmatprep.subr.mxu0 %v3095_v29 }
  0xf2   :  { %v151_v12 = vpop.f32.mrf.mxu0  ;;  %v228_v13 = vpop.f32.mrf.mxu1 }
  0xf3   :  { %v3082_v14 = vadd.f32 %v151_v12, %v80_v11 }
  0xf4   :  { %v2636_v15 = vpop.f32.mrf.mxu0  ;;  %v2647_v16 = vpop.f32.mrf.mxu1 }
  0xf5   :  { %v232_v17 = vadd.f32 %v228_v13, %v3082_v14 }
  0xf7   :  { %v2508_v18 = vmul.f32 -1.442695, %v232_v17 }
  0xf9   :  { %2755 = vpow2.f32 %v2508_v18 }
 0x106   :  { %v2756_v19 = vpop.eup %2755 }
 0x107   :  { %v236_v20 = vadd.f32 1.0, %v2756_v19 }
 0x109   :  { %2757 = vrcp.f32 %v236_v20 }
 0x116   :  { %v3085_v21 = vpop.eup %2757 }
 0x117   :  { %v239_v22 = vmul.f32 2.0, %v3085_v21  ;;  %v241_v26 = vmul.f32 0.0, %v3085_v21 }
 0x119   :  { %v2509_v23 = vadd.f32 -1.0, %v239_v22 }
 0x11b   :  { %243 = vrot.lane.b32.xlu0 %v2509_v23, %s2984_s0 }
 0x18d   :  { %v244_v24 = vpop.permute.xlu0 %243 }
 0x18e   :  { %v246_v25 = vmul.f32 %v3085_v21, %v244_v24 }
 0x190   :  { %248 = vrot.lane.b32.xlu0 %v246_v25, %s2985_s3 }
 0x202   :  { %v249_v27 = vpop.permute.xlu0 %248 }
 0x203   :  { %v3092_v28 = vadd.f32 %v249_v27, %v241_v26 }
 0x205   :  { %2759 = vtanh.f32 %v3092_v28 }
 0x212   :  { %v2760_v49 = vpop.eup %2759 }
 0x213   :  { %254 = vrot.lane.b32.xlu1 %v2760_v49, %s2984_s0 }
 0x285   :  { %v255_v54 = vpop.permute.xlu1 %254 }
 0x286   :  { %v257_v55 = vmul.f32 %v3085_v21, %v255_v54 }
 0x288   :  { %357 = vrot.lane.b32.xlu1 %v257_v55, %s2985_s3 }
 0x2fa   :  { %v358_v56 = vpop.permute.xlu1 %357 }
 0x2fb   :  { %2510 = vmatmul.mubr.msk.f32.vlgmr.msra.gmra.mxu1 %vm81_vm1, %v358_v56 }
 0x2fc   :  { %2649 = vmatpush3.msra.mxu1 %v3054_v3  ;;  %2656 = vmatprep.mubr.msk.f32.mxu1 %vm2983_vm0, %v2982_v1 }
 0x2fd   :  { %2650 = vmatprep.subr.mxu1 %v2982_v1 }
 0x2fe   :  { %2651 = vmatpush3.msra.mxu1 %v3057_v5 }
 0x2ff   :  { %2652 = vmatprep.subr.mxu1 %v2982_v1 }
 0x300   :  { %2653 = vmatpush3.msra.mxu1 %v3061_v7 }
 0x301   :  { %2654 = vmatprep.subr.mxu1 %v2982_v1 }
 0x302   :  { %2655 = vmatpush3.msra.mxu1 %v3066_v9 }
 0x303   :  { %2657 = vmatmul.mubr.msk.f32.vlgmr.msra.gmra.mxu1 %vm81_vm1, %v358_v56  ;;  %670 = vmatprep.subr.mxu1 %v3110_v34  ;;  %v434_v56 = vlaneseq }
 0x304   :  { %671 = vmatpush1.msra.mxu1 %v3119_v36  ;;  %710 = vmatprep.mubr.f32.mxu1 %v2982_v1 }
 0x305   :  { %672 = vmatprep.subr.mxu1 %v3128_v38 }
 0x306   :  { %673 = vmatpush1.msra.mxu1 %v3133_v39 }
 0x307   :  { %674 = vmatprep.subr.mxu1 %v3142_v41 }
 0x308   :  { %675 = vmatpush1.msra.mxu1 %v3151_v43 }
 0x309   :  { %676 = vmatprep.subr.mxu1 %v3156_v44 }
 0x30a   :  { %677 = vmatpush1.msra.mxu1 %v3165_v46 }
 0x30b   :  { %2659 = vmatprep.subr.mxu1 %v2982_v1 }
 0x3bb   :  { %v3235_v57 = vpop.f32.mrf.mxu1 }
 0x3bd   :  { %v3237_v58 = vpop.f32.mrf.mxu1 }
 0x3c3   :  { %v535_v59 = vpop.f32.mrf.mxu1 }
 0x3c4   :  { %v539_v60 = vadd.f32 %v535_v59, %v3082_v14  ;;  %v351_v59 = vpop.f32.mrf.mxu0 }
 0x3c5   :  { %v2658_v61 = vpop.f32.mrf.mxu1 }
 0x3c6   :  { %v2515_v62 = vmul.f32 -1.442695, %v539_v60  ;;  %v435_v60 = vshrl.u32 %v434_v56, 7 }
 0x3c8   :  { %2761 = vpow2.f32 %v2515_v62  ;;  %v440_v61 = vsub.s32 1, %v435_v60  ;;  %v353_v62 = vpop.f32.mrf.mxu0 }
 0x3d5   :  { %v2762_v63 = vpop.eup %2761 }
 0x3d6   :  { %v543_v0 = vadd.f32 1.0, %v2762_v63  ;;  %v432_v63 = vld [vmem:[%s3765_s6] sm:$0x3] }
 0x3d8   :  { %2763 = vrcp.f32 %v543_v0  ;;  %v430_v0 = vadd.f32 %v3237_v58, %v353_v62 }
 0x3e5   :  { %v2764_v2 = vpop.eup %2763 }
 0x3e6   :  { %v546_v4 = vmul.f32 2.0, %v2764_v2  ;;  %v548_v11 = vmul.f32 %v2764_v2, %v3092_v28 }
 0x3e8   :  { %v2516_v6 = vadd.f32 -1.0, %v546_v4 }
 0x3ea   :  { %550 = vrot.lane.b32.xlu0 %v2516_v6, %s2984_s0  ;;  %v436_v6 = vsub.s32 0, %v435_v60 }
 0x45c   :  { %v551_v8 = vpop.permute.xlu0 %550 }
 0x45d   :  { %v553_v10 = vmul.f32 %v2764_v2, %v551_v8 }
 0x45f   :  { %555 = vrot.lane.b32.xlu1 %v553_v10, %s2985_s3  ;;  %v428_v10 = vadd.f32 %v3235_v57, %v351_v59 }
 0x4d1   :  { %v556_v12 = vpop.permute.xlu1 %555 }
 0x4d2   :  { %v3243_v13 = vadd.f32 %v556_v12, %v548_v11  ;;  %v3284_v11 = vrot.slane %v432_v63, %v436_v6 }
 0x4d4   :  { %2765 = vtanh.f32 %v3243_v13  ;;  %v444_v12 = vadd.f32 %v3284_v11, %v428_v10 }
 0x4e1   :  { %v2766_v15 = vpop.eup %2765 }
 0x4e2   :  { %561 = vrot.lane.b32.xlu0 %v2766_v15, %s2984_s0  ;;  %v2511_v15 = vmul.f32 -1.442695, %v444_v12 }
 0x554   :  { %v562_v16 = vpop.permute.xlu0 %561 }
 0x555   :  { %v564_v17 = vmul.f32 %v2764_v2, %v562_v16  ;;  %v3280_v2 = vrot.slane %v432_v63, %v440_v61 }
 0x557   :  { %642 = vrot.lane.b32.xlu1 %v564_v17, %s2985_s3  ;;  %v445_v4 = vadd.f32 %v3280_v2, %v430_v0 }
 0x559   :  { %v2512_v8 = vmul.f32 -1.442695, %v445_v4 }
 0x5c9   :  { %v643_v18 = vpop.permute.xlu1 %642 }
 0x5ca   :  { %2518 = vmatmul.mubr.msk.f32.vlgmr.msra.gmra.mxu1 %vm81_vm1, %v643_v18 }
 0x5cb   :  { %2660 = vmatpush3.msra.mxu1 %v3054_v3  ;;  %2667 = vmatprep.mubr.msk.f32.mxu1 %vm2983_vm0, %v2982_v1 }
 0x5cc   :  { %2661 = vmatprep.subr.mxu1 %v2982_v1 }
 0x5cd   :  { %2662 = vmatpush3.msra.mxu1 %v3057_v5 }
 0x5ce   :  { %2663 = vmatprep.subr.mxu1 %v2982_v1 }
 0x5cf   :  { %2664 = vmatpush3.msra.mxu1 %v3061_v7 }
 0x5d0   :  { %2665 = vmatprep.subr.mxu1 %v2982_v1 }
 0x5d1   :  { %2666 = vmatpush3.msra.mxu1 %v3066_v9 }
 0x5d2   :  { %2668 = vmatmul.mubr.msk.f32.vlgmr.msra.gmra.mxu1 %vm81_vm1, %v643_v18  ;;  %943 = vmatprep.subr.mxu1 %v3110_v34 }
 0x5d3   :  { %944 = vmatpush1.msra.mxu1 %v3119_v36  ;;  %983 = vmatprep.mubr.f32.mxu1 %v2982_v1 }
 0x5d4   :  { %945 = vmatprep.subr.mxu1 %v3128_v38 }
 0x5d5   :  { %946 = vmatpush1.msra.mxu1 %v3133_v39 }
 0x5d6   :  { %947 = vmatprep.subr.mxu1 %v3142_v41 }
 0x5d7   :  { %948 = vmatpush1.msra.mxu1 %v3151_v43 }
 0x5d8   :  { %949 = vmatprep.subr.mxu1 %v3156_v44 }
 0x5d9   :  { %950 = vmatpush1.msra.mxu1 %v3165_v46 }
 0x5da   :  { %2670 = vmatprep.subr.mxu1 %v2982_v1 }
 0x68a   :  { %v3269_v19 = vpop.f32.mrf.mxu1 }
 0x68c   :  { %v3271_v20 = vpop.f32.mrf.mxu1 }
 0x692   :  { %v808_v21 = vpop.f32.mrf.mxu1 }
 0x693   :  { %v812_v22 = vadd.f32 %v808_v21, %v3082_v14 }
 0x694   :  { %v2669_v23 = vpop.f32.mrf.mxu1 }
 0x695   :  { %v2523_v24 = vmul.f32 -1.442695, %v812_v22 }
 0x697   :  { %2767 = vpow2.f32 %v2523_v24 }
 0x6a4   :  { %v2768_v25 = vpop.eup %2767 }
 0x6a5   :  { %v816_v26 = vadd.f32 1.0, %v2768_v25 }
 0x6a7   :  { %2769 = vrcp.f32 %v816_v26 }
 0x6a8   :  { %2771 = vpow2.f32 %v2512_v8 }
 0x6a9   :  { %2773 = vpow2.f32 %v2511_v15 }
 0x6b4   :  { %v2770_v27 = vpop.eup %2769 }
 0x6b5   :  { %v819_v28 = vmul.f32 2.0, %v2770_v27  ;;  %v2772_v16 = vpop.eup %2771  ;;  %v821_v58 = vmul.f32 %v2770_v27, %v3243_v13 }
 0x6b6   :  { %v453_v17 = vadd.f32 1.0, %v2772_v16  ;;  %v2774_v18 = vpop.eup %2773 }
 0x6b7   :  { %v2524_v49 = vadd.f32 -1.0, %v819_v28  ;;  %v452_v22 = vadd.f32 1.0, %v2774_v18 }
 0x6b8   :  { %2775 = vrcp.f32 %v453_v17 }
 0x6b9   :  { %823 = vrot.lane.b32.xlu0 %v2524_v49, %s2984_s0 }
 0x6c5   :  { %v2776_v57 = vpop.eup %2775 }
 0x6c6   :  { %v458_v24 = vmul.f32 2.0, %v2776_v57 }
 0x6c8   :  { %v2513_v25 = vadd.f32 -1.0, %v458_v24 }
 0x72b   :  { %v824_v54 = vpop.permute.xlu0 %823 }
 0x72c   :  { %v826_v55 = vmul.f32 %v2770_v27, %v824_v54 }
 0x72e   :  { %828 = vrot.lane.b32.xlu1 %v826_v55, %s2985_s3 }
 0x7a0   :  { %v829_v21 = vpop.permute.xlu1 %828 }
 0x7a1   :  { %v3288_v23 = vadd.f32 %v829_v21, %v821_v58 }
 0x7a3   :  { %2777 = vtanh.f32 %v3288_v23 }
 0x7a4   :  { %2779 = vrcp.f32 %v452_v22 }
 0x7b0   :  { %v2778_v26 = vpop.eup %2777 }
 0x7b1   :  { %834 = vrot.lane.b32.xlu0 %v2778_v26, %s2984_s0  ;;  %v2780_v28 = vpop.eup %2779 }
 0x7b2   :  { %v461_v49 = vmul.f32 %v2780_v28, %v2513_v25  ;;  %v460_v13 = vmul.f32 0.0, %v2780_v28 }
 0x7b5   :  { %463 = vrot.lane.b32.xlu0 %v461_v49, %s2984_s0 }
 0x823   :  { %v835_v54 = vpop.permute.xlu0 %834 }
 0x824   :  { %v837_v55 = vmul.f32 %v2770_v27, %v835_v54 }
 0x826   :  { %915 = vrot.lane.b32.xlu1 %v837_v55, %s2985_s3 }
 0x827   :  { %v464_v56 = vpop.permute.xlu0 %463 }
 0x828   :  { %v3294_v59 = vadd.f32 %v464_v56, %v460_v13 }
 0x82a   :  { %2781 = vtanh.f32 %v3294_v59 }
 0x837   :  { %v2782_v60 = vpop.eup %2781 }
 0x838   :  { %v3297_v61 = vmul.f32 %v2782_v60, %v2776_v57 }
 0x83a   :  { %566 = vrot.lane.b32.xlu1 %v3297_v61, %s2984_s0 }
 0x898   :  { %v916_v62 = vpop.permute.xlu1 %915 }
 0x899   :  { %2526 = vmatmul.mubr.msk.f32.vlgmr.msra.gmra.mxu1 %vm81_vm1, %v916_v62 }
 0x89a   :  { %2671 = vmatpush3.msra.mxu1 %v3054_v3  ;;  %2678 = vmatprep.mubr.msk.f32.mxu1 %vm2983_vm0, %v2982_v1 }
 0x89b   :  { %2672 = vmatprep.subr.mxu1 %v2982_v1 }
 0x89c   :  { %2673 = vmatpush3.msra.mxu1 %v3057_v5 }
 0x89d   :  { %2674 = vmatprep.subr.mxu1 %v2982_v1 }
 0x89e   :  { %2675 = vmatpush3.msra.mxu1 %v3061_v7 }
 0x89f   :  { %2676 = vmatprep.subr.mxu1 %v2982_v1 }
 0x8a0   :  { %2677 = vmatpush3.msra.mxu1 %v3066_v9 }
 0x8a1   :  { %2679 = vmatmul.mubr.msk.f32.vlgmr.msra.gmra.mxu1 %vm81_vm1, %v916_v62  ;;  %1216 = vmatprep.subr.mxu1 %v3110_v34 }
 0x8a2   :  { %1217 = vmatpush1.msra.mxu1 %v3119_v36  ;;  %1256 = vmatprep.mubr.f32.mxu1 %v2982_v1 }
 0x8a3   :  { %1218 = vmatprep.subr.mxu1 %v3128_v38 }
 0x8a4   :  { %1219 = vmatpush1.msra.mxu1 %v3133_v39 }
 0x8a5   :  { %1220 = vmatprep.subr.mxu1 %v3142_v41 }
 0x8a6   :  { %1221 = vmatpush1.msra.mxu1 %v3151_v43 }
 0x8a7   :  { %1222 = vmatprep.subr.mxu1 %v3156_v44 }
 0x8a8   :  { %1223 = vmatpush1.msra.mxu1 %v3165_v46 }
 0x8a9   :  { %2681 = vmatprep.subr.mxu1 %v2982_v1 }
 0x8ac   :  { %v567_v27 = vpop.permute.xlu1 %566 }
 0x8ad   :  { %2517 = vmatmul.mubr.msk.f32.vlgmr.msra.gmra.mxu0 %vm282_vm2, %v567_v27 }
 0x8ae   :  { %860 = vmatpush1.msra.mxu0 %v3097_v30  ;;  %907 = vmatprep.mubr.f32.mxu0 %v2982_v1 }
 0x8af   :  { %861 = vmatprep.subr.mxu0 %v3099_v31 }
 0x8b0   :  { %862 = vmatpush1.msra.mxu0 %v3102_v32 }
 0x8b1   :  { %863 = vmatprep.subr.mxu0 %v3105_v33 }
 0x8b2   :  { %864 = vmatpush1.msra.mxu0 %v3113_v35 }
 0x8b3   :  { %865 = vmatprep.subr.mxu0 %v3122_v37 }
 0x8b4   :  { %866 = vmatpush1.msra.mxu0 %v3136_v40 }
 0x8b5   :  { %867 = vmatprep.subr.mxu0 %v3145_v42 }
 0x8b6   :  { %868 = vmatpush1.msra.mxu0 %v3159_v45 }
 0x8b7   :  { %869 = vmatprep.subr.mxu0 %v3168_v47 }
 0x8b8   :  { %870 = vmatpush1.msra.mxu0 %v3172_v48 }
 0x8b9   :  { %871 = vmatprep.subr.mxu0 %v3176_v50 }
 0x8ba   :  { %872 = vmatpush1.msra.mxu0 %v3181_v51 }
 0x8bb   :  { %873 = vmatprep.subr.mxu0 %v3184_v52 }
 0x8bc   :  { %874 = vmatpush1.msra.mxu0 %v3188_v53 }
 0x8bd   :  { %1132 = vmatprep.subr.mxu0 %v3095_v29 }
 0x959   :  { %v3340_v63 = vpop.f32.mrf.mxu1 }
 0x95b   :  { %v3342_v0 = vpop.f32.mrf.mxu1 }
 0x961   :  { %v1081_v4 = vpop.f32.mrf.mxu1 }
 0x962   :  { %v1085_v6 = vadd.f32 %v1081_v4, %v3082_v14 }
 0x963   :  { %v2680_v8 = vpop.f32.mrf.mxu1 }
 0x964   :  { %v2531_v10 = vmul.f32 -1.442695, %v1085_v6 }
 0x966   :  { %2783 = vpow2.f32 %v2531_v10 }
 0x96d   :  { %v636_v22 = vpop.f32.mrf.mxu0 }
 0x96e   :  { %v713_v28 = vadd.f32 %v3269_v19, %v636_v22 }
 0x96f   :  { %v638_v57 = vpop.f32.mrf.mxu0 }
 0x970   :  { %v715_v24 = vadd.f32 %v3271_v20, %v638_v57  ;;  %v717_v49 = vadd.f32 %v713_v28, %v3284_v11 }
 0x972   :  { %v718_v25 = vadd.f32 %v715_v24, %v3280_v2  ;;  %v2519_v54 = vmul.f32 -1.442695, %v717_v49 }
 0x973   :  { %v2784_v12 = vpop.eup %2783 }
 0x974   :  { %v1089_v15 = vadd.f32 1.0, %v2784_v12  ;;  %v2520_v26 = vmul.f32 -1.442695, %v718_v25 }
 0x976   :  { %2785 = vrcp.f32 %v1089_v15 }
 0x977   :  { %2787 = vpow2.f32 %v2520_v26 }
 0x978   :  { %2789 = vpow2.f32 %v2519_v54 }
 0x983   :  { %v2786_v16 = vpop.eup %2785 }
 0x984   :  { %v1092_v17 = vmul.f32 2.0, %v2786_v16  ;;  %v2788_v55 = vpop.eup %2787  ;;  %v1094_v60 = vmul.f32 %v2786_v16, %v3288_v23 }
 0x985   :  { %v726_v13 = vadd.f32 1.0, %v2788_v55  ;;  %v2790_v56 = vpop.eup %2789 }
 0x986   :  { %v2532_v18 = vadd.f32 -1.0, %v1092_v17  ;;  %v725_v27 = vadd.f32 1.0, %v2790_v56 }
 0x987   :  { %2791 = vrcp.f32 %v726_v13 }
 0x988   :  { %1096 = vrot.lane.b32.xlu0 %v2532_v18, %s2984_s0 }
 0x994   :  { %v2792_v20 = vpop.eup %2791 }
 0x995   :  { %v731_v19 = vmul.f32 2.0, %v2792_v20 }
 0x997   :  { %v2521_v6 = vadd.f32 -1.0, %v731_v19 }
 0x9fa   :  { %v1097_v58 = vpop.permute.xlu0 %1096 }
 0x9fb   :  { %v1099_v21 = vmul.f32 %v2786_v16, %v1097_v58 }
 0x9fd   :  { %1101 = vrot.lane.b32.xlu1 %v1099_v21, %s2985_s3 }
 0xa6f   :  { %v1102_v62 = vpop.permute.xlu1 %1101 }
 0xa70   :  { %v3352_v4 = vadd.f32 %v1102_v62, %v1094_v60 }
 0xa72   :  { %2793 = vtanh.f32 %v3352_v4 }
 0xa73   :  { %2795 = vrcp.f32 %v725_v27 }
 0xa7f   :  { %v2794_v8 = vpop.eup %2793 }
 0xa80   :  { %1107 = vrot.lane.b32.xlu0 %v2794_v8, %s2984_s0  ;;  %v2796_v10 = vpop.eup %2795 }
 0xa81   :  { %v734_v12 = vmul.f32 %v2796_v10, %v2521_v6  ;;  %v733_v23 = vmul.f32 %v2796_v10, %v3294_v59 }
 0xa84   :  { %736 = vrot.lane.b32.xlu0 %v734_v12, %s2984_s0 }
 0xaf2   :  { %v1108_v15 = vpop.permute.xlu0 %1107 }
 0xaf3   :  { %v1110_v17 = vmul.f32 %v2786_v16, %v1108_v15 }
 0xaf5   :  { %1188 = vrot.lane.b32.xlu1 %v1110_v17, %s2985_s3 }
 0xaf6   :  { %v737_v18 = vpop.permute.xlu0 %736 }
 0xaf7   :  { %v3359_v58 = vadd.f32 %v737_v18, %v733_v23 }
 0xaf9   :  { %2797 = vtanh.f32 %v3359_v58 }
 0xb06   :  { %v2798_v21 = vpop.eup %2797 }
 0xb07   :  { %v3362_v22 = vmul.f32 %v2798_v21, %v2792_v20 }
 0xb09   :  { %839 = vrot.lane.b32.xlu1 %v3362_v22, %s2984_s0 }
 0xb67   :  { %v1189_v57 = vpop.permute.xlu1 %1188 }
 0xb68   :  { %2534 = vmatmul.mubr.msk.f32.vlgmr.msra.gmra.mxu1 %vm81_vm1, %v1189_v57 }
 0xb69   :  { %2682 = vmatpush3.msra.mxu1 %v3054_v3  ;;  %2689 = vmatprep.mubr.msk.f32.mxu1 %vm2983_vm0, %v2982_v1 }
 0xb6a   :  { %2683 = vmatprep.subr.mxu1 %v2982_v1 }
 0xb6b   :  { %2684 = vmatpush3.msra.mxu1 %v3057_v5 }
 0xb6c   :  { %2685 = vmatprep.subr.mxu1 %v2982_v1 }
 0xb6d   :  { %2686 = vmatpush3.msra.mxu1 %v3061_v7 }
 0xb6e   :  { %2687 = vmatprep.subr.mxu1 %v2982_v1 }
 0xb6f   :  { %2688 = vmatpush3.msra.mxu1 %v3066_v9 }
 0xb70   :  { %2690 = vmatmul.mubr.msk.f32.vlgmr.msra.gmra.mxu1 %vm81_vm1, %v1189_v57  ;;  %1489 = vmatprep.subr.mxu1 %v3110_v34 }
 0xb71   :  { %1490 = vmatpush1.msra.mxu1 %v3119_v36  ;;  %1529 = vmatprep.mubr.f32.mxu1 %v2982_v1 }
 0xb72   :  { %1491 = vmatprep.subr.mxu1 %v3128_v38 }
 0xb73   :  { %1492 = vmatpush1.msra.mxu1 %v3133_v39 }
 0xb74   :  { %1493 = vmatprep.subr.mxu1 %v3142_v41 }
 0xb75   :  { %1494 = vmatpush1.msra.mxu1 %v3151_v43 }
 0xb76   :  { %1495 = vmatprep.subr.mxu1 %v3156_v44 }
 0xb77   :  { %1496 = vmatpush1.msra.mxu1 %v3165_v46 }
 0xb78   :  { %2692 = vmatprep.subr.mxu1 %v2982_v1 }
 0xb7b   :  { %v840_v59 = vpop.permute.xlu1 %839 }
 0xb7c   :  { %2525 = vmatmul.mubr.msk.f32.vlgmr.msra.gmra.mxu0 %vm282_vm2, %v840_v59 }
 0xb7d   :  { %1133 = vmatpush1.msra.mxu0 %v3097_v30  ;;  %1180 = vmatprep.mubr.f32.mxu0 %v2982_v1 }
 0xb7e   :  { %1134 = vmatprep.subr.mxu0 %v3099_v31 }
 0xb7f   :  { %1135 = vmatpush1.msra.mxu0 %v3102_v32 }
 0xb80   :  { %1136 = vmatprep.subr.mxu0 %v3105_v33 }
 0xb81   :  { %1137 = vmatpush1.msra.mxu0 %v3113_v35 }
 0xb82   :  { %1138 = vmatprep.subr.mxu0 %v3122_v37 }
 0xb83   :  { %1139 = vmatpush1.msra.mxu0 %v3136_v40 }
 0xb84   :  { %1140 = vmatprep.subr.mxu0 %v3145_v42 }
 0xb85   :  { %1141 = vmatpush1.msra.mxu0 %v3159_v45 }
 0xb86   :  { %1142 = vmatprep.subr.mxu0 %v3168_v47 }
 0xb87   :  { %1143 = vmatpush1.msra.mxu0 %v3172_v48 }
 0xb88   :  { %1144 = vmatprep.subr.mxu0 %v3176_v50 }
 0xb89   :  { %1145 = vmatpush1.msra.mxu0 %v3181_v51 }
 0xb8a   :  { %1146 = vmatprep.subr.mxu0 %v3184_v52 }
 0xb8b   :  { %1147 = vmatpush1.msra.mxu0 %v3188_v53 }
 0xb8c   :  { %1405 = vmatprep.subr.mxu0 %v3095_v29 }
 0xc28   :  { %v3405_v16 = vpop.f32.mrf.mxu1 }
 0xc2a   :  { %v3407_v24 = vpop.f32.mrf.mxu1 }
 0xc30   :  { %v1354_v25 = vpop.f32.mrf.mxu1 }
 0xc31   :  { %v1358_v26 = vadd.f32 %v1354_v25, %v3082_v14 }
 0xc32   :  { %v2691_v28 = vpop.f32.mrf.mxu1 }
 0xc33   :  { %v2539_v49 = vmul.f32 -1.442695, %v1358_v26 }
 0xc35   :  { %2799 = vpow2.f32 %v2539_v49 }
 0xc3c   :  { %v909_v54 = vpop.f32.mrf.mxu0 }
 0xc3d   :  { %v986_v55 = vadd.f32 %v3340_v63, %v909_v54 }
 0xc3e   :  { %v911_v13 = vpop.f32.mrf.mxu0 }
 0xc3f   :  { %v990_v56 = vadd.f32 %v986_v55, %v3284_v11  ;;  %v988_v60 = vadd.f32 %v3342_v0, %v911_v13  ;;  %v2380_v13 = vrot.slane %v3362_v22, 7 }
 0xc41   :  { %v2527_v62 = vmul.f32 -1.442695, %v990_v56  ;;  %v991_v27 = vadd.f32 %v988_v60, %v3280_v2 }
 0xc42   :  { %v2800_v20 = vpop.eup %2799 }
 0xc43   :  { %v1362_v19 = vadd.f32 1.0, %v2800_v20  ;;  %v2528_v6 = vmul.f32 -1.442695, %v991_v27  ;;  %2801 = vpow2.f32 %v2527_v62  ;;  %v2396_v62 = vsel %vm2395_vm3, %v3297_v61, %v2380_v13 }
 0xc45   :  { %2803 = vrcp.f32 %v1362_v19 }
 0xc46   :  { %2805 = vpow2.f32 %v2528_v6 }
 0xc50   :  { %v2802_v8 = vpop.eup %2801 }
 0xc51   :  { %v998_v23 = vadd.f32 1.0, %v2802_v8 }
 0xc52   :  { %v2804_v10 = vpop.eup %2803 }
 0xc53   :  { %v2806_v12 = vpop.eup %2805  ;;  %v1365_v15 = vmul.f32 2.0, %v2804_v10 }
 0xc54   :  { %v999_v17 = vadd.f32 1.0, %v2806_v12 }
 0xc55   :  { %v2540_v63 = vadd.f32 -1.0, %v1365_v15 }
 0xc56   :  { %2807 = vrcp.f32 %v999_v17 }
 0xc57   :  { %1369 = vrot.lane.b32.xlu0 %v2540_v63, %s2984_s0  ;;  %2809 = vrcp.f32 %v998_v23 }
 0xc63   :  { %v2808_v0 = vpop.eup %2807 }
 0xc64   :  { %v1004_v18 = vmul.f32 2.0, %v2808_v0  ;;  %v2810_v57 = vpop.eup %2809 }
 0xc65   :  { %v1006_v28 = vmul.f32 %v2810_v57, %v3359_v58  ;;  %v1367_v58 = vmul.f32 %v2804_v10, %v3352_v4 }
 0xc66   :  { %v2529_v21 = vadd.f32 -1.0, %v1004_v18 }
 0xc68   :  { %v1007_v59 = vmul.f32 %v2810_v57, %v2529_v21 }
 0xc6a   :  { %1009 = vrot.lane.b32.xlu0 %v1007_v59, %s2984_s0 }
 0xcc9   :  { %v1370_v25 = vpop.permute.xlu0 %1369 }
 0xcca   :  { %v1372_v26 = vmul.f32 %v2804_v10, %v1370_v25 }
 0xccc   :  { %1374 = vrot.lane.b32.xlu1 %v1372_v26, %s2985_s3 }
 0xcdc   :  { %v1010_v49 = vpop.permute.xlu0 %1009 }
 0xcdd   :  { %v3418_v54 = vadd.f32 %v1010_v49, %v1006_v28 }
 0xcdf   :  { %2811 = vtanh.f32 %v3418_v54 }
 0xcec   :  { %v2812_v55 = vpop.eup %2811 }
 0xced   :  { %v1014_v56 = vmul.f32 %v2812_v55, %v2808_v0 }
 0xcef   :  { %1112 = vrot.lane.b32.xlu0 %v1014_v56, %s2984_s0  ;;  %v2382_v60 = vrot.slane %v1014_v56, 6 }
 0xcf1   :  { %v3424_v27 = vsel %vm2397_vm4, %v2396_v62, %v2382_v60 }
 0xd3e   :  { %v1375_v20 = vpop.permute.xlu1 %1374 }
 0xd3f   :  { %v3427_v19 = vadd.f32 %v1375_v20, %v1367_v58 }
 0xd41   :  { %2813 = vtanh.f32 %v3427_v19 }
 0xd4e   :  { %v2814_v6 = vpop.eup %2813 }
 0xd4f   :  { %1380 = vrot.lane.b32.xlu1 %v2814_v6, %s2984_s0 }
 0xd61   :  { %v1113_v22 = vpop.permute.xlu0 %1112 }
 0xd62   :  { %2533 = vmatmul.mubr.msk.f32.vlgmr.msra.gmra.mxu0 %vm282_vm2, %v1113_v22 }
 0xd63   :  { %1406 = vmatpush1.msra.mxu0 %v3097_v30  ;;  %1453 = vmatprep.mubr.f32.mxu0 %v2982_v1 }
 0xd64   :  { %1407 = vmatprep.subr.mxu0 %v3099_v31 }
 0xd65   :  { %1408 = vmatpush1.msra.mxu0 %v3102_v32 }
 0xd66   :  { %1409 = vmatprep.subr.mxu0 %v3105_v33 }
 0xd67   :  { %1410 = vmatpush1.msra.mxu0 %v3113_v35 }
 0xd68   :  { %1411 = vmatprep.subr.mxu0 %v3122_v37 }
 0xd69   :  { %1412 = vmatpush1.msra.mxu0 %v3136_v40 }
 0xd6a   :  { %1413 = vmatprep.subr.mxu0 %v3145_v42 }
 0xd6b   :  { %1414 = vmatpush1.msra.mxu0 %v3159_v45 }
 0xd6c   :  { %1415 = vmatprep.subr.mxu0 %v3168_v47 }
 0xd6d   :  { %1416 = vmatpush1.msra.mxu0 %v3172_v48 }
 0xd6e   :  { %1417 = vmatprep.subr.mxu0 %v3176_v50 }
 0xd6f   :  { %1418 = vmatpush1.msra.mxu0 %v3181_v51 }
 0xd70   :  { %1419 = vmatprep.subr.mxu0 %v3184_v52 }
 0xd71   :  { %1420 = vmatpush1.msra.mxu0 %v3188_v53 }
 0xd72   :  { %1678 = vmatprep.subr.mxu0 %v3095_v29 }
 0xdc1   :  { %v1381_v61 = vpop.permute.xlu1 %1380 }
 0xdc2   :  { %v1383_v4 = vmul.f32 %v2804_v10, %v1381_v61 }
 0xdc4   :  { %1461 = vrot.lane.b32.xlu1 %v1383_v4, %s2985_s3 }
 0xe22   :  { %v1182_v8 = vpop.f32.mrf.mxu0 }
 0xe23   :  { %v1259_v12 = vadd.f32 %v3405_v16, %v1182_v8 }
 0xe24   :  { %v1184_v15 = vpop.f32.mrf.mxu0 }
 0xe25   :  { %v1263_v17 = vadd.f32 %v1259_v12, %v3284_v11  ;;  %v1261_v63 = vadd.f32 %v3407_v24, %v1184_v15 }
 0xe27   :  { %v2535_v23 = vmul.f32 -1.442695, %v1263_v17  ;;  %v1264_v0 = vadd.f32 %v1261_v63, %v3280_v2 }
 0xe29   :  { %v2536_v18 = vmul.f32 -1.442695, %v1264_v0  ;;  %2815 = vpow2.f32 %v2535_v23  ;;  %v3519_v23 = vld [vmem:[#allocation5 + $0x18] sm:$0xff]  ;;  %v3525_v0 = vld [vmem:[#allocation5 + $0x10] sm:$0xff] }
 0xe2b   :  { %2817 = vpow2.f32 %v2536_v18  ;;  %v3529_v18 = vld [vmem:[#allocation5 + $0x8] sm:$0xff] }
 0xe36   :  { %v1462_v21 = vpop.permute.xlu1 %1461  ;;  %v2816_v57 = vpop.eup %2815 }
 0xe37   :  { %2542 = vmatmul.mubr.msk.f32.vlgmr.msra.gmra.mxu1 %vm81_vm1, %v1462_v21  ;;  %v1271_v24 = vadd.f32 1.0, %v2816_v57 }
 0xe38   :  { %v2818_v10 = vpop.eup %2817  ;;  %2693 = vmatpush3.msra.mxu1 %v3054_v3  ;;  %2700 = vmatprep.mubr.msk.f32.mxu1 %vm2983_vm0, %v2982_v1 }
 0xe39   :  { %v1272_v16 = vadd.f32 1.0, %v2818_v10  ;;  %2694 = vmatprep.subr.mxu1 %v2982_v1  ;;  %v3534_v10 = vld [vmem:[#allocation5] sm:$0xff] }
 0xe3a   :  { %2695 = vmatpush3.msra.mxu1 %v3057_v5 }
 0xe3b   :  { %2819 = vrcp.f32 %v1272_v16  ;;  %2696 = vmatprep.subr.mxu1 %v2982_v1 }
 0xe3c   :  { %2697 = vmatpush3.msra.mxu1 %v3061_v7  ;;  %2821 = vrcp.f32 %v1271_v24  ;;  %v3541_v24 = vld [vmem:[%s3763_s4 + $0x38] sm:$0xff] }
 0xe3d   :  { %2698 = vmatprep.subr.mxu1 %v2982_v1 }
 0xe3e   :  { %2699 = vmatpush3.msra.mxu1 %v3066_v9 }
 0xe3f   :  { %2701 = vmatmul.mubr.msk.f32.vlgmr.msra.gmra.mxu1 %vm81_vm1, %v1462_v21  ;;  %1762 = vmatprep.subr.mxu1 %v3110_v34 }
 0xe40   :  { %1763 = vmatpush1.msra.mxu1 %v3119_v36  ;;  %1802 = vmatprep.mubr.f32.mxu1 %v2982_v1 }
 0xe41   :  { %1764 = vmatprep.subr.mxu1 %v3128_v38 }
 0xe42   :  { %1765 = vmatpush1.msra.mxu1 %v3133_v39 }
 0xe43   :  { %1766 = vmatprep.subr.mxu1 %v3142_v41 }
 0xe44   :  { %1767 = vmatpush1.msra.mxu1 %v3151_v43 }
 0xe45   :  { %1768 = vmatprep.subr.mxu1 %v3156_v44 }
 0xe46   :  { %1769 = vmatpush1.msra.mxu1 %v3165_v46 }
 0xe47   :  { %2703 = vmatprep.subr.mxu1 %v2982_v1 }
 0xe48   :  { %v2820_v3 = vpop.eup %2819 }
 0xe49   :  { %v1277_v5 = vmul.f32 2.0, %v2820_v3  ;;  %v2822_v9 = vpop.eup %2821 }
 0xe4a   :  { %v1279_v46 = vmul.f32 %v2822_v9, %v3418_v54 }
 0xe4b   :  { %v2537_v7 = vadd.f32 -1.0, %v1277_v5  ;;  %v3548_v5 = vld [vmem:[%s3763_s4 + $0x30] sm:$0xff] }
 0xe4d   :  { %v1280_v34 = vmul.f32 %v2822_v9, %v2537_v7  ;;  %v3555_v9 = vld [vmem:[%s3763_s4 + $0x28] sm:$0xff] }
 0xe4f   :  { %1282 = vrot.lane.b32.xlu0 %v1280_v34, %s2984_s0  ;;  %v3562_v34 = vld [vmem:[%s3763_s4 + $0x20] sm:$0xff] }
 0xec1   :  { %v1283_v25 = vpop.permute.xlu0 %1282 }
 0xec2   :  { %v3478_v28 = vadd.f32 %v1283_v25, %v1279_v46  ;;  %v3600_v25 = vld [vmem:[#allocation7 + $0x60] sm:$0xff]  ;;  %v3603_v46 = vld [vmem:[#allocation7 + $0x58] sm:$0xff] }
 0xef7   :  { %v1531_v36 = vpop.f32.mrf.mxu1 }
 0xef9   :  { %v1533_v38 = vpop.f32.mrf.mxu1 }
 0xeff   :  { %v1627_v39 = vpop.f32.mrf.mxu1 }
 0xf00   :  { %v1631_v41 = vadd.f32 %v1627_v39, %v3082_v14  ;;  %v3582_v39 = vld [vmem:[%s3763_s4 + $0x8] sm:$0xff] }
 0xf01   :  { %v2702_v59 = vpop.f32.mrf.mxu1 }
 0xf02   :  { %v2547_v43 = vmul.f32 -1.442695, %v1631_v41  ;;  %v3588_v41 = vld [vmem:[%s3763_s4] sm:$0xff] }
 0xf04   :  { %2823 = vpow2.f32 %v2547_v43  ;;  %v3593_v43 = vld [vmem:[#allocation7 + $0x70] sm:$0xff] }
 0xf11   :  { %v2824_v44 = vpop.eup %2823 }
 0xf12   :  { %v1635_v26 = vadd.f32 1.0, %v2824_v44  ;;  %v3597_v44 = vld [vmem:[#allocation7 + $0x68] sm:$0xff] }
 0xf14   :  { %2825 = vrcp.f32 %v1635_v26  ;;  %v3606_v26 = vld [vmem:[#allocation7 + $0x50] sm:$0xff] }
 0xf15   :  { %2827 = vtanh.f32 %v3478_v28 }
 0xf21   :  { %v2826_v49 = vpop.eup %2825 }
 0xf22   :  { %v1638_v55 = vmul.f32 2.0, %v2826_v49  ;;  %v2828_v56 = vpop.eup %2827 }
 0xf23   :  { %v3482_v60 = vmul.f32 %v2828_v56, %v2820_v3  ;;  %v3621_v56 = vld [vmem:[#allocation7 + $0x28] sm:$0xff] }
 0xf24   :  { %v2548_v13 = vadd.f32 -1.0, %v1638_v55  ;;  %v3615_v55 = vld [vmem:[#allocation7 + $0x38] sm:$0xff] }
 0xf25   :  { %v2384_v57 = vrot.slane %v3482_v60, 5 }
 0xf26   :  { %1642 = vrot.lane.b32.xlu1 %v2548_v13, %s2984_s0  ;;  %v3618_v13 = vld [vmem:[#allocation7 + $0x30] sm:$0xff] }
 0xf27   :  { %v2400_v7 = vsel %vm2399_vm5, %v3424_v27, %v2384_v57  ;;  %v3570_v27 = vld [vmem:[%s3763_s4 + $0x18] sm:$0xff] }
 0xf2a   :  { %1385 = vrot.lane.b32.xlu1 %v3482_v60, %s2984_s0  ;;  %v3624_v60 = vld [vmem:[#allocation7 + $0x20] sm:$0xff] }
 0xf98   :  { %v1643_v62 = vpop.permute.xlu1 %1642 }
 0xf99   :  { %v1645_v58 = vmul.f32 %v2826_v49, %v1643_v62  ;;  %v3627_v62 = vld [vmem:[#allocation7 + $0x18] sm:$0xff] }
 0xf9b   :  { %1647 = vrot.lane.b32.xlu0 %v1645_v58, %s2985_s3  ;;  %v3630_v58 = vld [vmem:[#allocation7 + $0x10] sm:$0xff] }
 0xf9c   :  { %v1386_v54 = vpop.permute.xlu1 %1385 }
 0xf9d   :  { %2541 = vmatmul.mubr.msk.f32.vlgmr.msra.gmra.mxu0 %vm282_vm2, %v1386_v54  ;;  %v3633_v54 = vld [vmem:[#allocation7 + $0x8] sm:$0xff] }
 0xf9e   :  { %1679 = vmatpush1.msra.mxu0 %v3097_v30  ;;  %1726 = vmatprep.mubr.f32.mxu0 %v2982_v1  ;;  %v1640_v30 = vmul.f32 %v2826_v49, %v3427_v19 }
 0xf9f   :  { %1680 = vmatprep.subr.mxu0 %v3099_v31 }
 0xfa0   :  { %1681 = vmatpush1.msra.mxu0 %v3102_v32 }
 0xfa1   :  { %1682 = vmatprep.subr.mxu0 %v3105_v33 }
 0xfa2   :  { %1683 = vmatpush1.msra.mxu0 %v3113_v35 }
 0xfa3   :  { %1684 = vmatprep.subr.mxu0 %v3122_v37 }
 0xfa4   :  { %1685 = vmatpush1.msra.mxu0 %v3136_v40 }
 0xfa5   :  { %1686 = vmatprep.subr.mxu0 %v3145_v42 }
 0xfa6   :  { %1687 = vmatpush1.msra.mxu0 %v3159_v45 }
 0xfa7   :  { %1688 = vmatprep.subr.mxu0 %v3168_v47 }
 0xfa8   :  { %1689 = vmatpush1.msra.mxu0 %v3172_v48 }
 0xfa9   :  { %1690 = vmatprep.subr.mxu0 %v3176_v50 }
 0xfaa   :  { %1691 = vmatpush1.msra.mxu0 %v3181_v51 }
 0xfab   :  { %1692 = vmatprep.subr.mxu0 %v3184_v52 }
 0xfac   :  { %1693 = vmatpush1.msra.mxu0 %v3188_v53 }
 0xfad   :  { %1951 = vmatprep.subr.mxu0 %v3095_v29 }
0x100d   :  { %v1648_v31 = vpop.permute.xlu0 %1647 }
0x100e   :  { %v3506_v32 = vadd.f32 %v1648_v31, %v1640_v30  ;;  %v3636_v30 = vld [vmem:[#allocation7] sm:$0xff]  ;;  %v2910_v31 = vld [vmem:[#allocation7 + $0x78] sm:$0xff] }
0x1010   :  { %2829 = vtanh.f32 %v3506_v32 }
0x101d   :  { %v2830_v33 = vpop.eup %2829 }
0x101e   :  { %1653 = vrot.lane.b32.xlu0 %v2830_v33, %s2984_s0 }
0x105d   :  { %v1455_v35 = vpop.f32.mrf.mxu0 }
0x105e   :  { %v1532_v37 = vadd.f32 %v1531_v36, %v1455_v35 }
0x105f   :  { %v1457_v40 = vpop.f32.mrf.mxu0 }
0x1060   :  { %v1536_v42 = vadd.f32 %v1532_v37, %v3284_v11  ;;  %v1534_v45 = vadd.f32 %v1533_v38, %v1457_v40  ;;  %v3576_v38 = vld [vmem:[%s3763_s4 + $0x10] sm:$0xff] }
0x1062   :  { %v2543_v47 = vmul.f32 -1.442695, %v1536_v42  ;;  %v1537_v48 = vadd.f32 %v1534_v45, %v3280_v2 }
0x1064   :  { %v2544_v29 = vmul.f32 -1.442695, %v1537_v48  ;;  %2831 = vpow2.f32 %v2543_v47 }
0x1066   :  { %2833 = vpow2.f32 %v2544_v29 }
0x1071   :  { %v2832_v50 = vpop.eup %2831 }
0x1072   :  { %v1544_v53 = vadd.f32 1.0, %v2832_v50 }
0x1073   :  { %v2834_v51 = vpop.eup %2833 }
0x1074   :  { %v1545_v52 = vadd.f32 1.0, %v2834_v51 }
0x1076   :  { %2835 = vrcp.f32 %v1545_v52 }
0x1077   :  { %2837 = vrcp.f32 %v1544_v53 }
0x1083   :  { %v2836_v20 = vpop.eup %2835 }
0x1084   :  { %v1550_v19 = vmul.f32 2.0, %v2836_v20  ;;  %v2838_v22 = vpop.eup %2837 }
0x1085   :  { %v1552_v12 = vmul.f32 %v2838_v22, %v3478_v28  ;;  %v3609_v28 = vld [vmem:[#allocation7 + $0x48] sm:$0xff] }
0x1086   :  { %v2545_v6 = vadd.f32 -1.0, %v1550_v19 }
0x1088   :  { %v1553_v61 = vmul.f32 %v2838_v22, %v2545_v6 }
0x108a   :  { %1555 = vrot.lane.b32.xlu0 %v1553_v61, %s2984_s0 }
0x1090   :  { %v1654_v4 = vpop.permute.xlu0 %1653 }
0x1091   :  { %v1656_v8 = vmul.f32 %v2826_v49, %v1654_v4  ;;  %v3612_v49 = vld [vmem:[#allocation7 + $0x40] sm:$0xff] }
0x1093   :  { %1734 = vrot.lane.b32.xlu1 %v1656_v8, %s2985_s3 }
0x10fc   :  { %v1556_v15 = vpop.permute.xlu0 %1555 }
0x10fd   :  { %v3515_v17 = vadd.f32 %v1556_v15, %v1552_v12 }
0x10ff   :  { %2839 = vtanh.f32 %v3515_v17 }
0x1105   :  { %v1735_v63 = vpop.permute.xlu1 %1734 }
0x1106   :  { %2550 = vmatmul.mubr.msk.f32.vlgmr.msra.gmra.mxu1 %vm81_vm1, %v1735_v63 }
0x1107   :  { %2704 = vmatpush3.msra.mxu1 %v3519_v23  ;;  %2711 = vmatprep.mubr.msk.f32.mxu1 %vm2983_vm0, %v2982_v1 }
0x1108   :  { %2705 = vmatprep.subr.mxu1 %v2982_v1 }
0x1109   :  { %2706 = vmatpush3.msra.mxu1 %v3525_v0 }
0x110a   :  { %2707 = vmatprep.subr.mxu1 %v2982_v1 }
0x110b   :  { %2708 = vmatpush3.msra.mxu1 %v3529_v18 }
0x110c   :  { %v2840_v21 = vpop.eup %2839  ;;  %2709 = vmatprep.subr.mxu1 %v2982_v1 }
0x110d   :  { %2710 = vmatpush3.msra.mxu1 %v3534_v10  ;;  %v1560_v16 = vmul.f32 %v2840_v21, %v2836_v20 }
0x110e   :  { %2712 = vmatmul.mubr.msk.f32.vlgmr.msra.gmra.mxu1 %vm81_vm1, %v1735_v63  ;;  %2035 = vmatprep.subr.mxu1 %v3541_v24 }
0x110f   :  { %1658 = vrot.lane.b32.xlu1 %v1560_v16, %s2984_s0  ;;  %v2386_v3 = vrot.slane %v1560_v16, 4  ;;  %2036 = vmatpush1.msra.mxu1 %v3548_v5 }
0x1110   :  { %2037 = vmatprep.subr.mxu1 %v3555_v9  ;;  %2075 = vmatprep.mubr.f32.mxu1 %v2982_v1 }
0x1111   :  { %2038 = vmatpush1.msra.mxu1 %v3562_v34  ;;  %v3565_v36 = vsel %vm2401_vm6, %v2400_v7, %v2386_v3 }
0x1112   :  { %2039 = vmatprep.subr.mxu1 %v3570_v27 }
0x1113   :  { %2040 = vmatpush1.msra.mxu1 %v3576_v38 }
0x1114   :  { %2041 = vmatprep.subr.mxu1 %v3582_v39 }
0x1115   :  { %2042 = vmatpush1.msra.mxu1 %v3588_v41 }
0x1116   :  { %2714 = vmatprep.subr.mxu1 %v2982_v1 }
0x1181   :  { %v1659_v59 = vpop.permute.xlu1 %1658 }
0x1182   :  { %2549 = vmatmul.mubr.msk.f32.vlgmr.msra.gmra.mxu0 %vm282_vm2, %v1659_v59 }
0x1183   :  { %1952 = vmatpush1.msra.mxu0 %v3593_v43  ;;  %1999 = vmatprep.mubr.f32.mxu0 %v2982_v1 }
0x1184   :  { %1953 = vmatprep.subr.mxu0 %v3597_v44 }
0x1185   :  { %1954 = vmatpush1.msra.mxu0 %v3600_v25 }
0x1186   :  { %1955 = vmatprep.subr.mxu0 %v3603_v46 }
0x1187   :  { %1956 = vmatpush1.msra.mxu0 %v3606_v26 }
0x1188   :  { %1957 = vmatprep.subr.mxu0 %v3609_v28 }
0x1189   :  { %1958 = vmatpush1.msra.mxu0 %v3612_v49 }
0x118a   :  { %1959 = vmatprep.subr.mxu0 %v3615_v55 }
0x118b   :  { %1960 = vmatpush1.msra.mxu0 %v3618_v13 }
0x118c   :  { %1961 = vmatprep.subr.mxu0 %v3621_v56 }
0x118d   :  { %1962 = vmatpush1.msra.mxu0 %v3624_v60 }
0x118e   :  { %1963 = vmatprep.subr.mxu0 %v3627_v62 }
0x118f   :  { %1964 = vmatpush1.msra.mxu0 %v3630_v58 }
0x1190   :  { %1965 = vmatprep.subr.mxu0 %v3633_v54 }
0x1191   :  { %1966 = vmatpush1.msra.mxu0 %v3636_v30 }
0x1192   :  { %2224 = vmatprep.subr.mxu0 %v2910_v31 }
0x11c6   :  { %v1804_v33 = vpop.f32.mrf.mxu1 }
0x11c8   :  { %v1806_v35 = vpop.f32.mrf.mxu1 }
0x11ce   :  { %v1900_v37 = vpop.f32.mrf.mxu1 }
0x11cf   :  { %v1904_v40 = vadd.f32 %v1900_v37, %v3082_v14 }
0x11d0   :  { %v2713_v42 = vpop.f32.mrf.mxu1 }
0x11d1   :  { %v2555_v45 = vmul.f32 -1.442695, %v1904_v40 }
0x11d3   :  { %2841 = vpow2.f32 %v2555_v45 }
0x11e0   :  { %v2842_v47 = vpop.eup %2841 }
0x11e1   :  { %v1908_v48 = vadd.f32 1.0, %v2842_v47 }
0x11e3   :  { %2843 = vrcp.f32 %v1908_v48 }
0x11f0   :  { %v2844_v29 = vpop.eup %2843 }
0x11f1   :  { %v1911_v50 = vmul.f32 2.0, %v2844_v29  ;;  %v1913_v57 = vmul.f32 %v2844_v29, %v3506_v32 }
0x11f3   :  { %v2556_v51 = vadd.f32 -1.0, %v1911_v50 }
0x11f5   :  { %1915 = vrot.lane.b32.xlu0 %v2556_v51, %s2984_s0 }
0x1242   :  { %v1728_v20 = vpop.f32.mrf.mxu0 }
0x1243   :  { %v1805_v4 = vadd.f32 %v1804_v33, %v1728_v20 }
0x1244   :  { %v1730_v19 = vpop.f32.mrf.mxu0 }
0x1245   :  { %v1807_v6 = vadd.f32 %v1806_v35, %v1730_v19  ;;  %v1809_v8 = vadd.f32 %v1805_v4, %v3284_v11 }
0x1247   :  { %v1810_v22 = vadd.f32 %v1807_v6, %v3280_v2  ;;  %v2551_v12 = vmul.f32 -1.442695, %v1809_v8 }
0x1249   :  { %v2552_v61 = vmul.f32 -1.442695, %v1810_v22 }
0x124b   :  { %2845 = vpow2.f32 %v2552_v61 }
0x124c   :  { %2847 = vpow2.f32 %v2551_v12 }
0x1258   :  { %v2846_v15 = vpop.eup %2845 }
0x1259   :  { %v1818_v63 = vadd.f32 1.0, %v2846_v15  ;;  %v2848_v21 = vpop.eup %2847 }
0x125a   :  { %v1817_v3 = vadd.f32 1.0, %v2848_v21 }
0x125b   :  { %2849 = vrcp.f32 %v1818_v63 }
0x1267   :  { %v1916_v52 = vpop.permute.xlu0 %1915 }
0x1268   :  { %v1918_v53 = vmul.f32 %v2844_v29, %v1916_v52  ;;  %v2850_v59 = vpop.eup %2849 }
0x1269   :  { %v1823_v31 = vmul.f32 2.0, %v2850_v59 }
0x126a   :  { %1920 = vrot.lane.b32.xlu1 %v1918_v53, %s2985_s3 }
0x126b   :  { %v2553_v33 = vadd.f32 -1.0, %v1823_v31 }
0x12dc   :  { %v1921_v16 = vpop.permute.xlu1 %1920 }
0x12dd   :  { %v3645_v7 = vadd.f32 %v1921_v16, %v1913_v57 }
0x12df   :  { %2851 = vtanh.f32 %v3645_v7 }
0x12e0   :  { %2853 = vrcp.f32 %v1817_v3 }
0x12ec   :  { %v2852_v35 = vpop.eup %2851 }
0x12ed   :  { %1926 = vrot.lane.b32.xlu0 %v2852_v35, %s2984_s0  ;;  %v2854_v37 = vpop.eup %2853 }
0x12ee   :  { %v1826_v40 = vmul.f32 %v2854_v37, %v2553_v33  ;;  %v1825_v32 = vmul.f32 %v2854_v37, %v3515_v17 }
0x12f1   :  { %1828 = vrot.lane.b32.xlu0 %v1826_v40, %s2984_s0 }
0x135f   :  { %v1927_v42 = vpop.permute.xlu0 %1926 }
0x1360   :  { %v1929_v45 = vmul.f32 %v2844_v29, %v1927_v42 }
0x1362   :  { %2007 = vrot.lane.b32.xlu1 %v1929_v45, %s2985_s3 }
0x1363   :  { %v1829_v47 = vpop.permute.xlu0 %1828 }
0x1364   :  { %v3652_v48 = vadd.f32 %v1829_v47, %v1825_v32 }
0x1366   :  { %2855 = vtanh.f32 %v3652_v48 }
0x1373   :  { %v2856_v50 = vpop.eup %2855 }
0x1374   :  { %v1833_v51 = vmul.f32 %v2856_v50, %v2850_v59 }
0x1376   :  { %1931 = vrot.lane.b32.xlu1 %v1833_v51, %s2984_s0  ;;  %v2388_v52 = vrot.slane %v1833_v51, 3 }
0x1378   :  { %v3657_v53 = vsel %vm2403_vm7, %v3565_v36, %v2388_v52 }
0x13d4   :  { %v2008_v20 = vpop.permute.xlu1 %2007 }
0x13d5   :  { %2558 = vmatmul.mubr.msk.f32.vlgmr.msra.gmra.mxu1 %vm81_vm1, %v2008_v20 }
0x13d6   :  { %2715 = vmatpush3.msra.mxu1 %v3519_v23  ;;  %2722 = vmatprep.mubr.msk.f32.mxu1 %vm2983_vm0, %v2982_v1 }
0x13d7   :  { %2716 = vmatprep.subr.mxu1 %v2982_v1 }
0x13d8   :  { %2717 = vmatpush3.msra.mxu1 %v3525_v0 }
0x13d9   :  { %2718 = vmatprep.subr.mxu1 %v2982_v1 }
0x13da   :  { %2719 = vmatpush3.msra.mxu1 %v3529_v18 }
0x13db   :  { %2720 = vmatprep.subr.mxu1 %v2982_v1 }
0x13dc   :  { %2721 = vmatpush3.msra.mxu1 %v3534_v10 }
0x13dd   :  { %2723 = vmatmul.mubr.msk.f32.vlgmr.msra.gmra.mxu1 %vm81_vm1, %v2008_v20  ;;  %2308 = vmatprep.subr.mxu1 %v3541_v24 }
0x13de   :  { %2309 = vmatpush1.msra.mxu1 %v3548_v5  ;;  %2348 = vmatprep.mubr.f32.mxu1 %v2982_v1 }
0x13df   :  { %2310 = vmatprep.subr.mxu1 %v3555_v9 }
0x13e0   :  { %2311 = vmatpush1.msra.mxu1 %v3562_v34 }
0x13e1   :  { %2312 = vmatprep.subr.mxu1 %v3570_v27 }
0x13e2   :  { %2313 = vmatpush1.msra.mxu1 %v3576_v38 }
0x13e3   :  { %2314 = vmatprep.subr.mxu1 %v3582_v39 }
0x13e4   :  { %2315 = vmatpush1.msra.mxu1 %v3588_v41 }
0x13e5   :  { %2725 = vmatprep.subr.mxu1 %v2982_v1 }
0x13e8   :  { %v1932_v17 = vpop.permute.xlu1 %1931 }
0x13e9   :  { %2557 = vmatmul.mubr.msk.f32.vlgmr.msra.gmra.mxu0 %vm282_vm2, %v1932_v17 }
0x13ea   :  { %2225 = vmatpush1.msra.mxu0 %v3593_v43  ;;  %2272 = vmatprep.mubr.f32.mxu0 %v2982_v1 }
0x13eb   :  { %2226 = vmatprep.subr.mxu0 %v3597_v44 }
0x13ec   :  { %2227 = vmatpush1.msra.mxu0 %v3600_v25 }
0x13ed   :  { %2228 = vmatprep.subr.mxu0 %v3603_v46 }
0x13ee   :  { %2229 = vmatpush1.msra.mxu0 %v3606_v26 }
0x13ef   :  { %2230 = vmatprep.subr.mxu0 %v3609_v28 }
0x13f0   :  { %2231 = vmatpush1.msra.mxu0 %v3612_v49 }
0x13f1   :  { %2232 = vmatprep.subr.mxu0 %v3615_v55 }
0x13f2   :  { %2233 = vmatpush1.msra.mxu0 %v3618_v13 }
0x13f3   :  { %2234 = vmatprep.subr.mxu0 %v3621_v56 }
0x13f4   :  { %2235 = vmatpush1.msra.mxu0 %v3624_v60 }
0x13f5   :  { %2236 = vmatprep.subr.mxu0 %v3627_v62 }
0x13f6   :  { %2237 = vmatpush1.msra.mxu0 %v3630_v58 }
0x13f7   :  { %2238 = vmatprep.subr.mxu0 %v3633_v54 }
0x13f8   :  { %2239 = vmatpush1.msra.mxu0 %v3636_v30 }
0x1495   :  { %v2077_v23 = vpop.f32.mrf.mxu1 }
0x1497   :  { %v2079_v0 = vpop.f32.mrf.mxu1 }
0x149d   :  { %v2173_v18 = vpop.f32.mrf.mxu1 }
0x149e   :  { %v2177_v10 = vadd.f32 %v2173_v18, %v3082_v14 }
0x149f   :  { %v2724_v24 = vpop.f32.mrf.mxu1 }
0x14a0   :  { %v2563_v5 = vmul.f32 -1.442695, %v2177_v10  ;;  %v2414_v10 = vld [vmem:[%s3766_s7 + $0x28] sm:$0xff]  ;;  %v2413_v24 = vld [vmem:[%s3766_s7 + $0x20] sm:$0xff] }
0x14a2   :  { %2857 = vpow2.f32 %v2563_v5  ;;  %v2412_v5 = vld [vmem:[%s3766_s7 + $0x18] sm:$0xff] }
0x14a9   :  { %v2001_v9 = vpop.f32.mrf.mxu0 }
0x14aa   :  { %v2078_v34 = vadd.f32 %v2077_v23, %v2001_v9  ;;  %v2411_v9 = vld [vmem:[%s3766_s7 + $0x10] sm:$0xff] }
0x14ab   :  { %v2003_v36 = vpop.f32.mrf.mxu0 }
0x14ac   :  { %v2082_v27 = vadd.f32 %v2078_v34, %v3284_v11  ;;  %v2080_v38 = vadd.f32 %v2079_v0, %v2003_v36  ;;  %v2410_v34 = vld [vmem:[%s3766_s7 + $0x8] sm:$0xff]  ;;  %v2409_v36 = vld [vmem:[%s3766_s7] sm:$0xff] }
0x14ae   :  { %v2559_v39 = vmul.f32 -1.442695, %v2082_v27  ;;  %v2083_v41 = vadd.f32 %v2080_v38, %v3280_v2 }
0x14af   :  { %v2858_v43 = vpop.eup %2857 }
0x14b0   :  { %v2181_v44 = vadd.f32 1.0, %v2858_v43  ;;  %v2560_v25 = vmul.f32 -1.442695, %v2083_v41  ;;  %2859 = vpow2.f32 %v2559_v39 }
0x14b2   :  { %2861 = vrcp.f32 %v2181_v44 }
0x14b3   :  { %2863 = vpow2.f32 %v2560_v25 }
0x14bd   :  { %v2860_v46 = vpop.eup %2859 }
0x14be   :  { %v2090_v13 = vadd.f32 1.0, %v2860_v46 }
0x14bf   :  { %v2862_v14 = vpop.eup %2861 }
0x14c0   :  { %v2864_v26 = vpop.eup %2863  ;;  %v2184_v28 = vmul.f32 2.0, %v2862_v14  ;;  %v2186_v15 = vmul.f32 %v2862_v14, %v3645_v7 }
0x14c1   :  { %v2091_v49 = vadd.f32 1.0, %v2864_v26 }
0x14c2   :  { %v2564_v55 = vadd.f32 -1.0, %v2184_v28 }
0x14c3   :  { %2865 = vrcp.f32 %v2091_v49 }
0x14c4   :  { %2188 = vrot.lane.b32.xlu0 %v2564_v55, %s2984_s0  ;;  %2867 = vrcp.f32 %v2090_v13 }
0x14d0   :  { %v2866_v56 = vpop.eup %2865 }
0x14d1   :  { %v2096_v60 = vmul.f32 2.0, %v2866_v56  ;;  %v2868_v58 = vpop.eup %2867 }
0x14d2   :  { %v2098_v19 = vmul.f32 %v2868_v58, %v3652_v48 }
0x14d3   :  { %v2561_v62 = vadd.f32 -1.0, %v2096_v60 }
0x14d5   :  { %v2099_v54 = vmul.f32 %v2868_v58, %v2561_v62 }
0x14d7   :  { %2101 = vrot.lane.b32.xlu0 %v2099_v54, %s2984_s0 }
0x1536   :  { %v2189_v30 = vpop.permute.xlu0 %2188 }
0x1537   :  { %v2191_v29 = vmul.f32 %v2862_v14, %v2189_v30 }
0x1539   :  { %2193 = vrot.lane.b32.xlu1 %v2191_v29, %s2985_s3 }
0x1549   :  { %v2102_v6 = vpop.permute.xlu0 %2101 }
0x154a   :  { %v3704_v22 = vadd.f32 %v2102_v6, %v2098_v19 }
0x154c   :  { %2869 = vtanh.f32 %v3704_v22 }
0x1559   :  { %v2870_v61 = vpop.eup %2869 }
0x155a   :  { %v2106_v4 = vmul.f32 %v2870_v61, %v2866_v56 }
0x155c   :  { %2204 = vrot.lane.b32.xlu0 %v2106_v4, %s2984_s0  ;;  %v2390_v8 = vrot.slane %v2106_v4, 2 }
0x155e   :  { %v3709_v12 = vsel %vm2405_vm8, %v3657_v53, %v2390_v8 }
0x15ab   :  { %v2194_v63 = vpop.permute.xlu1 %2193 }
0x15ac   :  { %v2196_v21 = vadd.f32 %v2194_v63, %v2186_v15 }
0x15ae   :  { %2871 = vtanh.f32 %v2196_v21 }
0x15bb   :  { %v2872_v57 = vpop.eup %2871 }
0x15bc   :  { %2199 = vrot.lane.b32.xlu1 %v2872_v57, %s2984_s0 }
0x15ce   :  { %v2205_v16 = vpop.permute.xlu0 %2204 }
0x15cf   :  { %2565 = vmatmul.mubr.msk.f32.vlgmr.msra.gmra.mxu0 %vm282_vm2, %v2205_v16 }
0x162e   :  { %v2200_v3 = vpop.permute.xlu1 %2199 }
0x162f   :  { %v2202_v59 = vmul.f32 %v2862_v14, %v2200_v3  ;;  %v2570_v14 = vld [vmem:[#allocation2] ss:$0 sm:$0xff] }
0x1631   :  { %2280 = vrot.lane.b32.xlu1 %v2202_v59, %s2985_s3 }
0x168f   :  { %v2274_v7 = vpop.f32.mrf.mxu0 }
0x1691   :  { %v2276_v37 = vpop.f32.mrf.mxu0 }
0x16a3   :  { %v2281_v31 = vpop.permute.xlu1 %2280 }
0x16a4   :  { %2566 = vmatmul.mubr.msk.f32.vlgmr.msra.gmra.mxu1 %vm81_vm1, %v2281_v31 }
0x16a5   :  { %2741 = vmatprep.mubr.msk.f32.mxu1 %vm2983_vm0, %v2982_v1 }
0x1764   :  { %v2350_v33 = vpop.f32.mrf.mxu1 }
0x1765   :  { %v2351_v35 = vadd.f32 %v2350_v33, %v2274_v7 }
0x1766   :  { %v2352_v40 = vpop.f32.mrf.mxu1 }
0x1767   :  { %v2355_v42 = vadd.f32 %v2351_v35, %v3284_v11  ;;  %v2353_v45 = vadd.f32 %v2352_v40, %v2276_v37  ;;  %v2415_v11 = vld [vmem:[%s3766_s7 + $0x30] sm:$0xff] }
0x1769   :  { %v2567_v32 = vmul.f32 -1.442695, %v2355_v42  ;;  %v2356_v47 = vadd.f32 %v2353_v45, %v3280_v2  ;;  %v2416_v2 = vld [vmem:[%s3766_s7 + $0x38] sm:$0xff] }
0x176a   :  { %2726 = vmatpush3.msra.mxu1 %v2416_v2 }
0x176b   :  { %v2568_v48 = vmul.f32 -1.442695, %v2356_v47  ;;  %2873 = vpow2.f32 %v2567_v32  ;;  %2727 = vmatprep.subr.mxu1 %v2982_v1 }
0x176c   :  { %2728 = vmatpush3.msra.mxu1 %v2415_v11 }
0x176d   :  { %2875 = vpow2.f32 %v2568_v48  ;;  %2729 = vmatprep.subr.mxu1 %v2982_v1 }
0x176e   :  { %2730 = vmatpush3.msra.mxu1 %v2414_v10 }
0x176f   :  { %2731 = vmatprep.subr.mxu1 %v2982_v1 }
0x1770   :  { %2732 = vmatpush3.msra.mxu1 %v2413_v24 }
0x1771   :  { %2733 = vmatprep.subr.mxu1 %v2982_v1 }
0x1772   :  { %2734 = vmatpush3.msra.mxu1 %v2412_v5 }
0x1773   :  { %2735 = vmatprep.subr.mxu1 %v2982_v1 }
0x1774   :  { %2736 = vmatpush3.msra.mxu1 %v2411_v9 }
0x1775   :  { %2737 = vmatprep.subr.mxu1 %v2982_v1 }
0x1776   :  { %2738 = vmatpush3.msra.mxu1 %v2410_v34 }
0x1777   :  { %2739 = vmatprep.subr.mxu1 %v2982_v1 }
0x1778   :  { %v2874_v50 = vpop.eup %2873  ;;  %2740 = vmatpush3.msra.mxu1 %v2409_v36 }
0x1779   :  { %v2363_v53 = vadd.f32 1.0, %v2874_v50 }
0x177a   :  { %v2876_v51 = vpop.eup %2875 }
0x177b   :  { %v2364_v52 = vadd.f32 1.0, %v2876_v51 }
0x177d   :  { %2877 = vrcp.f32 %v2364_v52 }
0x177e   :  { %2879 = vrcp.f32 %v2363_v53 }
0x178a   :  { %v2878_v20 = vpop.eup %2877 }
0x178b   :  { %v2369_v17 = vmul.f32 2.0, %v2878_v20  ;;  %v2880_v0 = vpop.eup %2879 }
0x178c   :  { %v2371_v27 = vmul.f32 %v2880_v0, %v3704_v22 }
0x178d   :  { %v2569_v23 = vadd.f32 -1.0, %v2369_v17 }
0x178f   :  { %v2372_v18 = vmul.f32 %v2880_v0, %v2569_v23 }
0x1791   :  { %2374 = vrot.lane.b32.xlu0 %v2372_v18, %s2984_s0 }
0x1803   :  { %v2375_v38 = vpop.permute.xlu0 %2374 }
0x1804   :  { %v2377_v39 = vadd.f32 %v2375_v38, %v2371_v27 }
0x1806   :  { %2881 = vtanh.f32 %v2377_v39 }
0x1813   :  { %v2882_v41 = vpop.eup %2881 }
0x1814   :  { %v2379_v43 = vmul.f32 %v2882_v41, %v2878_v20 }
0x1816   :  { %v2393_v44 = vrot.slane %v2379_v43, 1 }
0x1818   :  { %v2408_v25 = vsel %vm2407_vm9, %v3709_v12, %v2393_v44 }
0x1819   :  { %2425 = vrot.lane.b32.xlu1 %v2408_v25, %s2984_s0 }
0x188b   :  { %v2426_v46 = vpop.permute.xlu1 %2425 }
0x188c   :  { %2742 = vmatmul.mubr.msk.f32.vlgmr.msra.gmra.mxu1 %vm282_vm2, %v2426_v46 }
0x194c   :  { %v2495_v26 = vpop.f32.mrf.mxu1 }
0x194d   :  { %v2496_v1 = vadd.f32 %v2570_v14, %v2495_v26 }
0x194e   :  { %v2743_v28 = vpop.f32.mrf.mxu1 }
0x194f   :  { %2500 = vst.msk [vmem:[%s3768_s9] sm:$0xff] %vm2499_vm10, %v2496_v1 }
0x1950   :  { %2505 = vsyncpa [#allocation4], 1 }
0x1951   :  { %2506 = vsyncpa [#allocation6], 1 }

</bundles_post_ra>
